<compile_context>
chip_gen: v7x
topology: tpu7x:2x2x1
jax: 0.10.0
libtpu: 0.0.40
codegen_flags: <defaults>
</compile_context>

<pallas_src>
import functools
import math

import jax
import jax.numpy as jnp
from jax.experimental import pallas as pl
from jax.experimental.pallas import tpu as pltpu

NH_PAD = 128  # head axis padded to one full lane width


def attn_rnn_seq_kernel(
    x_ref,                 # (chunk, B, H) embedded inputs for this time chunk
    wh_ref,                # (H, 2H)  fused [Wq | Wg_h]
    bq_ref,                # (1, H)
    wo_ref, bo_ref,        # (H, H), (1, H)
    wga_ref, bg_ref,       # (H, H), (1, H)
    gamma_ref, beta_ref,   # (1, H), (1, H)
    wfc_ref, bfc_ref,      # (H, O), (1, O)
    hm_ref, hmt_ref,       # (H, NH_PAD), (NH_PAD, H) one-hot head membership
    logits_ref, hlast_ref,  # outputs: (B, O), (B, H)
    h_state,               # VMEM scratch (B, H) f32 -- resident hidden state
    *, head_dim, init_value):
    ci = pl.program_id(0)
    chunk, B, H = x_ref.shape

    # Initialize the hidden state once, at the first time chunk.
    @pl.when(ci == 0)
    def _init():
        h_state[...] = jnp.full((B, H), init_value, dtype=h_state.dtype)

    # Weights are VMEM-resident across the whole grid (constant index_maps).
    wh = wh_ref[...]
    bq = bq_ref[...]
    wo = wo_ref[...]
    bo = bo_ref[...]
    wga = wga_ref[...]
    bg = bg_ref[...]
    gamma = gamma_ref[...]
    beta = beta_ref[...]
    hm = hm_ref[...]        # (H, NH_PAD)
    hmt = hmt_ref[...]      # (NH_PAD, H)

    inv_sqrt_hd = 1.0 / math.sqrt(head_dim)
    inv_sqrt2 = 1.0 / math.sqrt(2.0)

    h = h_state[...]
    # Small static trip count -> fully unrolled; gives the scheduler full
    # visibility of each cell body.
    for t in range(chunk):
        x_t = x_ref[t]                      # (B, H); proj_layer is Identity

        # Fused h-projection: q_proj and the h-half of the update gate.
        hq = jnp.dot(h, wh, preferred_element_type=jnp.float32)   # (B, 2H)
        q = hq[:, :H] + bq
        gate_h = hq[:, H:]

        # 4 context positions: [h, x, h+x, h*x]
        c0, c1, c2, c3 = h, x_t, h + x_t, h * x_t

        # Batched per-head scores: one (4B, H) @ (H, NH_PAD) matmul instead of
        # four tiny ones; padded head columns (>= num_heads) are all-zero.
        qc = jnp.concatenate([q * c0, q * c1, q * c2, q * c3], axis=0)
        s = jnp.dot(qc, hm, preferred_element_type=jnp.float32) * inv_sqrt_hd
        s0, s1, s2, s3 = s[:B], s[B:2 * B], s[2 * B:3 * B], s[3 * B:]

        # Softmax over the 4 context positions (per batch row, per head).
        m = jnp.maximum(jnp.maximum(s0, s1), jnp.maximum(s2, s3))
        e0 = jnp.exp(s0 - m)
        e1 = jnp.exp(s1 - m)
        e2 = jnp.exp(s2 - m)
        e3 = jnp.exp(s3 - m)
        inv = pl.reciprocal(e0 + e1 + e2 + e3, approx=True)   # EUP slot

        # Batched broadcast back to features: one (4B, NH_PAD) @ (NH_PAD, H)
        # matmul; padded head rows of hmt are zero so they contribute nothing.
        wstk = jnp.concatenate([e0 * inv, e1 * inv, e2 * inv, e3 * inv], axis=0)
        wb = jnp.dot(wstk, hmt, preferred_element_type=jnp.float32)   # (4B, H)
        attn = (wb[:B] * c0 + wb[B:2 * B] * c1
                + wb[2 * B:3 * B] * c2 + wb[3 * B:] * c3)             # (B, H)

        # out_proj + exact (erf) GELU, matching F.gelu default.
        attn = jnp.dot(attn, wo, preferred_element_type=jnp.float32) + bo
        attn = 0.5 * attn * (1.0 + jax.lax.erf(attn * inv_sqrt2))

        # Update gate: sigmoid(Linear(concat([h, attn]))); the h-half was
        # already computed by the fused matmul above.
        gate = jax.nn.sigmoid(
            gate_h + jnp.dot(attn, wga, preferred_element_type=jnp.float32) + bg)

        # LayerNorm(attn + h) over the hidden dim (eps=1e-5, biased variance).
        sln = attn + h
        mean = jnp.mean(sln, axis=-1, keepdims=True)
        var = jnp.mean((sln - mean) ** 2, axis=-1, keepdims=True)
        cand = (sln - mean) * jax.lax.rsqrt(var + 1e-5) * gamma + beta

        h = gate * cand + (1.0 - gate) * h

    h_state[...] = h

    # At the last chunk: emit the final hidden state and the classifier logits
    # (fc folded into the kernel; single HBM write each for the whole seq).
    @pl.when(ci == pl.num_programs(0) - 1)
    def _finalize():
        hlast_ref[...] = h.astype(hlast_ref.dtype)
        logits_ref[...] = (
            jnp.dot(h, wfc_ref[...], preferred_element_type=jnp.float32)
            + bfc_ref[...]).astype(logits_ref.dtype)


def _pick_chunk(T, target):
    c = max(1, min(target, T))
    while T % c:
        c -= 1
    return c


def _resident_2d(arr):
    # Full-array block with an index_map constant in time -> DMA'd once,
    # stays resident in VMEM for the whole grid.
    return pl.BlockSpec(arr.shape, lambda c: (0, 0))


def custom_attn_rnn_forward(token_ids, params, num_heads, *,
                            init_value=1e-3, chunk_target=4):
    emb_table = params["embedding"]
    H = emb_table.shape[1]
    O = params["Wfc"].shape[1]
    B, T = token_ids.shape
    assert H % num_heads == 0
    head_dim = H // num_heads

    # ---- hoisted non-recurrent input path -------------------------------
    # TODO(synk): the nn.Embedding lookup is left as one XLA gather here (the
    # hoisted input projection); proj_layer is Identity since input==hidden.
    x_seq = jnp.take(emb_table, token_ids, axis=0)                  # (B, T, H)
    x_seq = jnp.transpose(x_seq, (1, 0, 2)).astype(jnp.float32)     # (T, B, H)

    chunk = _pick_chunk(T, chunk_target)
    nc = T // chunk

    # ---- weights prepared once per sequence ------------------------------
    Wh = jnp.concatenate([params["Wq"], params["Wg"][:H, :]], axis=1)  # (H, 2H)
    Wga = params["Wg"][H:, :]                                          # (H, H)
    bq = params["bq"].reshape(1, H)
    bo = params["bo"].reshape(1, H)
    bg = params["bg"].reshape(1, H)
    gamma = params["gamma"].reshape(1, H)
    beta = params["beta"].reshape(1, H)
    Wfc = params["Wfc"]
    bfc = params["bfc"].reshape(1, O)

    # One-hot head-membership matrix, head axis padded to 128 lanes.
    hm = (jnp.arange(H)[:, None] // head_dim ==
          jnp.arange(NH_PAD)[None, :]).astype(jnp.float32)          # (H, 128)
    hmt = hm.T                                                       # (128, H)

    inputs = (x_seq, Wh, bq, params["Wo"], bo, Wga, bg, gamma, beta,
              Wfc, bfc, hm, hmt)

    grid_spec = pltpu.PrefetchScalarGridSpec(
        num_scalar_prefetch=0,
        grid=(nc,),
        in_specs=[pl.BlockSpec((chunk, B, H), lambda c: (c, 0, 0))]
                 + [_resident_2d(a) for a in inputs[1:]],
        out_specs=[pl.BlockSpec((B, O), lambda c: (0, 0)),
                   pl.BlockSpec((B, H), lambda c: (0, 0))],
        scratch_shapes=[pltpu.VMEM((B, H), jnp.float32)],
    )

    logits, h_last = pl.pallas_call(
        functools.partial(attn_rnn_seq_kernel,
                          head_dim=head_dim, init_value=init_value),
        out_shape=(jax.ShapeDtypeStruct((B, O), jnp.float32),
                   jax.ShapeDtypeStruct((B, H), jnp.float32)),
        grid_spec=grid_spec,
        compiler_params=pltpu.CompilerParams(
            dimension_semantics=("arbitrary",)),   # time is a recurrence
    )(*inputs)
    return logits, h_last


# ---------------------------- pure-JAX reference -----------------------------

def _cell_reference(h, x, p, num_heads):
    B, H = h.shape
    hd = H // num_heads
    context = jnp.stack([h, x, h + x, h * x], axis=1)                 # (B,4,H)
    q = h @ p["Wq"] + p["bq"]
    qh = q.reshape(B, 1, num_heads, hd).transpose(0, 2, 1, 3)
    kh = context.reshape(B, 4, num_heads, hd).transpose(0, 2, 1, 3)
    scores = jnp.einsum("bhqd,bhkd->bhqk", qh, kh) / math.sqrt(hd)
    w = jax.nn.softmax(scores, axis=-1)
    ao = jnp.einsum("bhqk,bhkd->bhqd", w, kh)
    ao = ao.transpose(0, 2, 1, 3).reshape(B, H)
    ao = ao @ p["Wo"] + p["bo"]
    ao = jax.nn.gelu(ao, approximate=False)
    gate = jax.nn.sigmoid(jnp.concatenate([h, ao], axis=-1) @ p["Wg"] + p["bg"])
    s = ao + h
    mean = s.mean(-1, keepdims=True)
    var = ((s - mean) ** 2).mean(-1, keepdims=True)
    cand = (s - mean) / jnp.sqrt(var + 1e-5) * p["gamma"] + p["beta"]
    return gate * cand + (1.0 - gate) * h


def custom_attn_rnn_reference(token_ids, p, num_heads, init_value=1e-3):
    emb = jnp.take(p["embedding"], token_ids, axis=0)                 # (B,T,H)
    B, T, H = emb.shape
    h = jnp.full((B, H), init_value, jnp.float32)
    for t in range(T):
        h = _cell_reference(h, emb[:, t, :], p, num_heads)
    logits = h @ p["Wfc"] + p["bfc"]
    return logits, h


if __name__ == "__main__":
    VOCAB, HIDDEN, OUT_SIZE, NUM_HEADS = 64, 32, 2, 4
    B, T = 8, 8

    key = jax.random.PRNGKey(0)
    ks = jax.random.split(key, 12)

    def init(k, shape, scale=0.1):
        return (scale * jax.random.normal(k, shape)).astype(jnp.float32)

    params = {
        "embedding": init(ks[0], (VOCAB, HIDDEN), 0.5),
        "Wq": init(ks[1], (HIDDEN, HIDDEN)),
        "bq": init(ks[2], (HIDDEN,)),
        "Wo": init(ks[3], (HIDDEN, HIDDEN)),
        "bo": init(ks[4], (HIDDEN,)),
        "Wg": init(ks[5], (2 * HIDDEN, HIDDEN)),
        "bg": init(ks[6], (HIDDEN,)),
        "gamma": jnp.ones((HIDDEN,), jnp.float32),
        "beta": jnp.zeros((HIDDEN,), jnp.float32),
        "Wfc": init(ks[7], (HIDDEN, OUT_SIZE)),
        "bfc": init(ks[8], (OUT_SIZE,)),
    }

    token_ids = jax.random.randint(ks[9], (B, T), 0, VOCAB)

    logits, h_last = custom_attn_rnn_forward(token_ids, params, NUM_HEADS)
    logits, h_last = jax.block_until_ready((logits, h_last))

    ref_logits, ref_h = custom_attn_rnn_reference(token_ids, params, NUM_HEADS)

    assert logits.shape == (B, OUT_SIZE) and h_last.shape == (B, HIDDEN)
    # Tolerance covers the EUP approximate-reciprocal softmax normalization
    # accumulated over T recurrent steps (everything else is f32).
    assert jnp.allclose(h_last, ref_h, atol=5e-3, rtol=5e-3), (
        float(jnp.max(jnp.abs(h_last - ref_h))))
    assert jnp.allclose(logits, ref_logits, atol=5e-3, rtol=5e-3), (
        float(jnp.max(jnp.abs(logits - ref_logits))))

    print("KERNEL_OK")
</pallas_src>

<mosaic_0001>
module attributes {stable_mosaic.version = 11 : i64} {
  func.func @attn_rnn_seq_kernel(%arg0: i32, %arg1: memref<4x8x32xf32, #tpu.memory_space<vmem>>, %arg2: memref<32x64xf32, #tpu.memory_space<vmem>>, %arg3: memref<1x32xf32, #tpu.memory_space<vmem>>, %arg4: memref<32x32xf32, #tpu.memory_space<vmem>>, %arg5: memref<1x32xf32, #tpu.memory_space<vmem>>, %arg6: memref<32x32xf32, #tpu.memory_space<vmem>>, %arg7: memref<1x32xf32, #tpu.memory_space<vmem>>, %arg8: memref<1x32xf32, #tpu.memory_space<vmem>>, %arg9: memref<1x32xf32, #tpu.memory_space<vmem>>, %arg10: memref<32x2xf32, #tpu.memory_space<vmem>>, %arg11: memref<1x2xf32, #tpu.memory_space<vmem>>, %arg12: memref<32x128xf32, #tpu.memory_space<vmem>>, %arg13: memref<128x32xf32, #tpu.memory_space<vmem>>, %arg14: memref<8x2xf32, #tpu.memory_space<vmem>>, %arg15: memref<8x32xf32, #tpu.memory_space<vmem>>, %arg16: memref<8x32xf32, #tpu.memory_space<vmem>>) attributes {dimension_semantics = [#tpu.dimension_semantics<arbitrary>], iteration_bounds = array<i64: 2>, scalar_prefetch = 0 : i64, scratch_operands = 1 : i64, tpu.core_type = #tpu.core_type<tc>, window_params = [{transform_indices = @transform_0, window_bounds = array<i64: 4, 8, 32>}, {pipeline_mode = #tpu.pipeline_mode<synchronous>, transform_indices = @transform_1, window_bounds = array<i64: 32, 64>}, {pipeline_mode = #tpu.pipeline_mode<synchronous>, transform_indices = @transform_2, window_bounds = array<i64: 1, 32>}, {pipeline_mode = #tpu.pipeline_mode<synchronous>, transform_indices = @transform_3, window_bounds = array<i64: 32, 32>}, {pipeline_mode = #tpu.pipeline_mode<synchronous>, transform_indices = @transform_4, window_bounds = array<i64: 1, 32>}, {pipeline_mode = #tpu.pipeline_mode<synchronous>, transform_indices = @transform_5, window_bounds = array<i64: 32, 32>}, {pipeline_mode = #tpu.pipeline_mode<synchronous>, transform_indices = @transform_6, window_bounds = array<i64: 1, 32>}, {pipeline_mode = #tpu.pipeline_mode<synchronous>, transform_indices = @transform_7, window_bounds = array<i64: 1, 32>}, {pipeline_mode = #tpu.pipeline_mode<synchronous>, transform_indices = @transform_8, window_bounds = array<i64: 1, 32>}, {pipeline_mode = #tpu.pipeline_mode<synchronous>, transform_indices = @transform_9, window_bounds = array<i64: 32, 2>}, {pipeline_mode = #tpu.pipeline_mode<synchronous>, transform_indices = @transform_10, window_bounds = array<i64: 1, 2>}, {pipeline_mode = #tpu.pipeline_mode<synchronous>, transform_indices = @transform_11, window_bounds = array<i64: 32, 128>}, {pipeline_mode = #tpu.pipeline_mode<synchronous>, transform_indices = @transform_12, window_bounds = array<i64: 128, 32>}, {pipeline_mode = #tpu.pipeline_mode<synchronous>, transform_indices = @transform_13, window_bounds = array<i64: 8, 2>}, {pipeline_mode = #tpu.pipeline_mode<synchronous>, transform_indices = @transform_14, window_bounds = array<i64: 8, 32>}]} {
    %c0_i32 = arith.constant 0 : i32
    %0 = arith.cmpi eq, %arg0, %c0_i32 : i32
    %1 = arith.extui %0 : i1 to i32
    %c0_i32_0 = arith.constant 0 : i32
    %2 = arith.cmpi ne, %1, %c0_i32_0 : i32
    scf.if %2 {
      %cst_97 = arith.constant 1.000000e-03 : f32
      %422 = vector.broadcast %cst_97 : f32 to vector<8x32xf32>
      %c0_98 = arith.constant 0 : index
      %c0_99 = arith.constant 0 : index
      %423 = vector.load %arg16[%c0_98, %c0_99] : memref<8x32xf32, #tpu.memory_space<vmem>>, vector<8x32xf32>
      tpu.vector_store %arg16[%c0_98, %c0_99], %422 {strides = array<i32>} : memref<8x32xf32, #tpu.memory_space<vmem>>, vector<8x32xf32>,
    } else {
    }
    %c0 = arith.constant 0 : index
    %c0_1 = arith.constant 0 : index
    %3 = vector.load %arg2[%c0, %c0_1] : memref<32x64xf32, #tpu.memory_space<vmem>>, vector<32x64xf32>
    %c0_2 = arith.constant 0 : index
    %c0_3 = arith.constant 0 : index
    %4 = vector.load %arg3[%c0_2, %c0_3] : memref<1x32xf32, #tpu.memory_space<vmem>>, vector<1x32xf32>
    %c0_4 = arith.constant 0 : index
    %c0_5 = arith.constant 0 : index
    %5 = vector.load %arg4[%c0_4, %c0_5] : memref<32x32xf32, #tpu.memory_space<vmem>>, vector<32x32xf32>
    %c0_6 = arith.constant 0 : index
    %c0_7 = arith.constant 0 : index
    %6 = vector.load %arg5[%c0_6, %c0_7] : memref<1x32xf32, #tpu.memory_space<vmem>>, vector<1x32xf32>
    %c0_8 = arith.constant 0 : index
    %c0_9 = arith.constant 0 : index
    %7 = vector.load %arg6[%c0_8, %c0_9] : memref<32x32xf32, #tpu.memory_space<vmem>>, vector<32x32xf32>
    %c0_10 = arith.constant 0 : index
    %c0_11 = arith.constant 0 : index
    %8 = vector.load %arg7[%c0_10, %c0_11] : memref<1x32xf32, #tpu.memory_space<vmem>>, vector<1x32xf32>
    %c0_12 = arith.constant 0 : index
    %c0_13 = arith.constant 0 : index
    %9 = vector.load %arg8[%c0_12, %c0_13] : memref<1x32xf32, #tpu.memory_space<vmem>>, vector<1x32xf32>
    %c0_14 = arith.constant 0 : index
    %c0_15 = arith.constant 0 : index
    %10 = vector.load %arg9[%c0_14, %c0_15] : memref<1x32xf32, #tpu.memory_space<vmem>>, vector<1x32xf32>
    %c0_16 = arith.constant 0 : index
    %c0_17 = arith.constant 0 : index
    %11 = vector.load %arg12[%c0_16, %c0_17] : memref<32x128xf32, #tpu.memory_space<vmem>>, vector<32x128xf32>
    %c0_18 = arith.constant 0 : index
    %c0_19 = arith.constant 0 : index
    %12 = vector.load %arg13[%c0_18, %c0_19] : memref<128x32xf32, #tpu.memory_space<vmem>>, vector<128x32xf32>
    %c0_20 = arith.constant 0 : index
    %c0_21 = arith.constant 0 : index
    %13 = vector.load %arg16[%c0_20, %c0_21] : memref<8x32xf32, #tpu.memory_space<vmem>>, vector<8x32xf32>
    %c0_22 = arith.constant 0 : index
    %c0_23 = arith.constant 0 : index
    %c0_24 = arith.constant 0 : index
    %14 = vector.load %arg1[%c0_22, %c0_23, %c0_24] : memref<4x8x32xf32, #tpu.memory_space<vmem>>, vector<1x8x32xf32>
    %15 = vector.shape_cast %14 : vector<1x8x32xf32> to vector<8x32xf32>
    %cst = arith.constant dense<0.000000e+00> : vector<8x64xf32>
    %16 = tpu.matmul %13, %3, %cst {dimension_numbers = #tpu.dot_dimension_numbers<[1], [0], [0], [1], [0, 0, 1, 1], [], []>} : vector<8x32xf32>, vector<32x64xf32>, vector<8x64xf32> -> vector<8x64xf32>
    %17 = vector.extract_strided_slice %16 {offsets = [0, 0], sizes = [8, 32], strides = [1, 1]} : vector<8x64xf32> to vector<8x32xf32>
    %18 = vector.broadcast %4 : vector<1x32xf32> to vector<8x32xf32>
    %19 = arith.addf %17, %18 : vector<8x32xf32>
    %20 = vector.extract_strided_slice %16 {offsets = [0, 32], sizes = [8, 32], strides = [1, 1]} : vector<8x64xf32> to vector<8x32xf32>
    %21 = arith.addf %13, %15 : vector<8x32xf32>
    %22 = arith.mulf %13, %15 : vector<8x32xf32>
    %23 = arith.mulf %19, %13 : vector<8x32xf32>
    %24 = arith.mulf %19, %15 : vector<8x32xf32>
    %25 = arith.mulf %19, %21 : vector<8x32xf32>
    %26 = arith.mulf %19, %22 : vector<8x32xf32>
    %27 = tpu.concatenate %23, %24, %25, %26 in 0 : vector<8x32xf32>, vector<8x32xf32>, vector<8x32xf32>, vector<8x32xf32> -> vector<32x32xf32>
    %cst_25 = arith.constant dense<0.000000e+00> : vector<32x128xf32>
    %28 = tpu.matmul %27, %11, %cst_25 {dimension_numbers = #tpu.dot_dimension_numbers<[1], [0], [0], [1], [0, 0, 1, 1], [], []>} : vector<32x32xf32>, vector<32x128xf32>, vector<32x128xf32> -> vector<32x128xf32>
    %cst_26 = arith.constant 0.353553385 : f32
    %29 = vector.broadcast %cst_26 : f32 to vector<32x128xf32>
    %30 = arith.mulf %28, %29 : vector<32x128xf32>
    %31 = vector.extract_strided_slice %30 {offsets = [0, 0], sizes = [8, 128], strides = [1, 1]} : vector<32x128xf32> to vector<8x128xf32>
    %32 = vector.extract_strided_slice %30 {offsets = [8, 0], sizes = [8, 128], strides = [1, 1]} : vector<32x128xf32> to vector<8x128xf32>
    %33 = vector.extract_strided_slice %30 {offsets = [16, 0], sizes = [8, 128], strides = [1, 1]} : vector<32x128xf32> to vector<8x128xf32>
    %34 = vector.extract_strided_slice %30 {offsets = [24, 0], sizes = [8, 128], strides = [1, 1]} : vector<32x128xf32> to vector<8x128xf32>
    %35 = arith.maximumf %31, %32 : vector<8x128xf32>
    %36 = arith.maximumf %33, %34 : vector<8x128xf32>
    %37 = arith.maximumf %35, %36 : vector<8x128xf32>
    %38 = arith.subf %31, %37 : vector<8x128xf32>
    %39 = math.exp %38 : vector<8x128xf32>
    %40 = arith.subf %32, %37 : vector<8x128xf32>
    %41 = math.exp %40 : vector<8x128xf32>
    %42 = arith.subf %33, %37 : vector<8x128xf32>
    %43 = math.exp %42 : vector<8x128xf32>
    %44 = arith.subf %34, %37 : vector<8x128xf32>
    %45 = math.exp %44 : vector<8x128xf32>
    %46 = arith.addf %39, %41 : vector<8x128xf32>
    %47 = arith.addf %46, %43 : vector<8x128xf32>
    %48 = arith.addf %47, %45 : vector<8x128xf32>
    %49 = tpu.reciprocal %48 {approx = true} : vector<8x128xf32> -> vector<8x128xf32>
    %50 = arith.mulf %39, %49 : vector<8x128xf32>
    %51 = arith.mulf %41, %49 : vector<8x128xf32>
    %52 = arith.mulf %43, %49 : vector<8x128xf32>
    %53 = arith.mulf %45, %49 : vector<8x128xf32>
    %54 = tpu.concatenate %50, %51, %52, %53 in 0 : vector<8x128xf32>, vector<8x128xf32>, vector<8x128xf32>, vector<8x128xf32> -> vector<32x128xf32>
    %cst_27 = arith.constant dense<0.000000e+00> : vector<32x32xf32>
    %55 = tpu.matmul %54, %12, %cst_27 {dimension_numbers = #tpu.dot_dimension_numbers<[1], [0], [0], [1], [0, 0, 1, 1], [], []>} : vector<32x128xf32>, vector<128x32xf32>, vector<32x32xf32> -> vector<32x32xf32>
    %56 = vector.extract_strided_slice %55 {offsets = [0, 0], sizes = [8, 32], strides = [1, 1]} : vector<32x32xf32> to vector<8x32xf32>
    %57 = arith.mulf %56, %13 : vector<8x32xf32>
    %58 = vector.extract_strided_slice %55 {offsets = [8, 0], sizes = [8, 32], strides = [1, 1]} : vector<32x32xf32> to vector<8x32xf32>
    %59 = arith.mulf %58, %15 : vector<8x32xf32>
    %60 = arith.addf %57, %59 : vector<8x32xf32>
    %61 = vector.extract_strided_slice %55 {offsets = [16, 0], sizes = [8, 32], strides = [1, 1]} : vector<32x32xf32> to vector<8x32xf32>
    %62 = arith.mulf %61, %21 : vector<8x32xf32>
    %63 = arith.addf %60, %62 : vector<8x32xf32>
    %64 = vector.extract_strided_slice %55 {offsets = [24, 0], sizes = [8, 32], strides = [1, 1]} : vector<32x32xf32> to vector<8x32xf32>
    %65 = arith.mulf %64, %22 : vector<8x32xf32>
    %66 = arith.addf %63, %65 : vector<8x32xf32>
    %cst_28 = arith.constant dense<0.000000e+00> : vector<8x32xf32>
    %67 = tpu.matmul %66, %5, %cst_28 {dimension_numbers = #tpu.dot_dimension_numbers<[1], [0], [0], [1], [0, 0, 1, 1], [], []>} : vector<8x32xf32>, vector<32x32xf32>, vector<8x32xf32> -> vector<8x32xf32>
    %68 = vector.broadcast %6 : vector<1x32xf32> to vector<8x32xf32>
    %69 = arith.addf %67, %68 : vector<8x32xf32>
    %cst_29 = arith.constant 5.000000e-01 : f32
    %70 = vector.broadcast %cst_29 : f32 to vector<8x32xf32>
    %71 = arith.mulf %70, %69 : vector<8x32xf32>
    %cst_30 = arith.constant 0.707106769 : f32
    %72 = vector.broadcast %cst_30 : f32 to vector<8x32xf32>
    %73 = arith.mulf %69, %72 : vector<8x32xf32>
    %74 = math.erf %73 : vector<8x32xf32>
    %cst_31 = arith.constant 1.000000e+00 : f32
    %75 = vector.broadcast %cst_31 : f32 to vector<8x32xf32>
    %76 = arith.addf %75, %74 : vector<8x32xf32>
    %77 = arith.mulf %71, %76 : vector<8x32xf32>
    %cst_32 = arith.constant dense<0.000000e+00> : vector<8x32xf32>
    %78 = tpu.matmul %77, %7, %cst_32 {dimension_numbers = #tpu.dot_dimension_numbers<[1], [0], [0], [1], [0, 0, 1, 1], [], []>} : vector<8x32xf32>, vector<32x32xf32>, vector<8x32xf32> -> vector<8x32xf32>
    %79 = arith.addf %20, %78 : vector<8x32xf32>
    %80 = vector.broadcast %8 : vector<1x32xf32> to vector<8x32xf32>
    %81 = arith.addf %79, %80 : vector<8x32xf32>
    %82 = arith.negf %81 : vector<8x32xf32>
    %83 = math.exp %82 : vector<8x32xf32>
    %cst_33 = arith.constant 1.000000e+00 : f32
    %84 = vector.broadcast %cst_33 : f32 to vector<8x32xf32>
    %85 = arith.addf %84, %83 : vector<8x32xf32>
    %86 = arith.divf %84, %85 : vector<8x32xf32>
    %87 = arith.addf %77, %13 : vector<8x32xf32>
    %cst_34 = arith.constant dense<0.000000e+00> : vector<8xf32>
    %88 = vector.multi_reduction <add>, %87, %cst_34 [1] : vector<8x32xf32> to vector<8xf32>
    %89 = vector.shape_cast %88 : vector<8xf32> to vector<8x1xf32>
    %cst_35 = arith.constant 3.200000e+01 : f32
    %90 = vector.broadcast %cst_35 : f32 to vector<8x1xf32>
    %91 = arith.divf %89, %90 : vector<8x1xf32>
    %92 = vector.broadcast %91 : vector<8x1xf32> to vector<8x32xf32>
    %93 = arith.subf %87, %92 : vector<8x32xf32>
    %94 = arith.mulf %93, %93 : vector<8x32xf32>
    %cst_36 = arith.constant dense<0.000000e+00> : vector<8xf32>
    %95 = vector.multi_reduction <add>, %94, %cst_36 [1] : vector<8x32xf32> to vector<8xf32>
    %96 = vector.shape_cast %95 : vector<8xf32> to vector<8x1xf32>
    %cst_37 = arith.constant 3.200000e+01 : f32
    %97 = vector.broadcast %cst_37 : f32 to vector<8x1xf32>
    %98 = arith.divf %96, %97 : vector<8x1xf32>
    %99 = vector.broadcast %91 : vector<8x1xf32> to vector<8x32xf32>
    %100 = arith.subf %87, %99 : vector<8x32xf32>
    %cst_38 = arith.constant 9.99999974E-6 : f32
    %101 = vector.broadcast %cst_38 : f32 to vector<8x1xf32>
    %102 = arith.addf %98, %101 : vector<8x1xf32>
    %103 = math.rsqrt %102 : vector<8x1xf32>
    %104 = vector.broadcast %103 : vector<8x1xf32> to vector<8x32xf32>
    %105 = arith.mulf %100, %104 : vector<8x32xf32>
    %106 = vector.broadcast %9 : vector<1x32xf32> to vector<8x32xf32>
    %107 = arith.mulf %105, %106 : vector<8x32xf32>
    %108 = vector.broadcast %10 : vector<1x32xf32> to vector<8x32xf32>
    %109 = arith.addf %107, %108 : vector<8x32xf32>
    %110 = arith.mulf %86, %109 : vector<8x32xf32>
    %cst_39 = arith.constant 1.000000e+00 : f32
    %111 = vector.broadcast %cst_39 : f32 to vector<8x32xf32>
    %112 = arith.subf %111, %86 : vector<8x32xf32>
    %113 = arith.mulf %112, %13 : vector<8x32xf32>
    %114 = arith.addf %110, %113 : vector<8x32xf32>
    %c1 = arith.constant 1 : index
    %c0_40 = arith.constant 0 : index
    %c0_41 = arith.constant 0 : index
    %115 = vector.load %arg1[%c1, %c0_40, %c0_41] : memref<4x8x32xf32, #tpu.memory_space<vmem>>, vector<1x8x32xf32>
    %116 = vector.shape_cast %115 : vector<1x8x32xf32> to vector<8x32xf32>
    %cst_42 = arith.constant dense<0.000000e+00> : vector<8x64xf32>
    %117 = tpu.matmul %114, %3, %cst_42 {dimension_numbers = #tpu.dot_dimension_numbers<[1], [0], [0], [1], [0, 0, 1, 1], [], []>} : vector<8x32xf32>, vector<32x64xf32>, vector<8x64xf32> -> vector<8x64xf32>
    %118 = vector.extract_strided_slice %117 {offsets = [0, 0], sizes = [8, 32], strides = [1, 1]} : vector<8x64xf32> to vector<8x32xf32>
    %119 = vector.broadcast %4 : vector<1x32xf32> to vector<8x32xf32>
    %120 = arith.addf %118, %119 : vector<8x32xf32>
    %121 = vector.extract_strided_slice %117 {offsets = [0, 32], sizes = [8, 32], strides = [1, 1]} : vector<8x64xf32> to vector<8x32xf32>
    %122 = arith.addf %114, %116 : vector<8x32xf32>
    %123 = arith.mulf %114, %116 : vector<8x32xf32>
    %124 = arith.mulf %120, %114 : vector<8x32xf32>
    %125 = arith.mulf %120, %116 : vector<8x32xf32>
    %126 = arith.mulf %120, %122 : vector<8x32xf32>
    %127 = arith.mulf %120, %123 : vector<8x32xf32>
    %128 = tpu.concatenate %124, %125, %126, %127 in 0 : vector<8x32xf32>, vector<8x32xf32>, vector<8x32xf32>, vector<8x32xf32> -> vector<32x32xf32>
    %cst_43 = arith.constant dense<0.000000e+00> : vector<32x128xf32>
    %129 = tpu.matmul %128, %11, %cst_43 {dimension_numbers = #tpu.dot_dimension_numbers<[1], [0], [0], [1], [0, 0, 1, 1], [], []>} : vector<32x32xf32>, vector<32x128xf32>, vector<32x128xf32> -> vector<32x128xf32>
    %cst_44 = arith.constant 0.353553385 : f32
    %130 = vector.broadcast %cst_44 : f32 to vector<32x128xf32>
    %131 = arith.mulf %129, %130 : vector<32x128xf32>
    %132 = vector.extract_strided_slice %131 {offsets = [0, 0], sizes = [8, 128], strides = [1, 1]} : vector<32x128xf32> to vector<8x128xf32>
    %133 = vector.extract_strided_slice %131 {offsets = [8, 0], sizes = [8, 128], strides = [1, 1]} : vector<32x128xf32> to vector<8x128xf32>
    %134 = vector.extract_strided_slice %131 {offsets = [16, 0], sizes = [8, 128], strides = [1, 1]} : vector<32x128xf32> to vector<8x128xf32>
    %135 = vector.extract_strided_slice %131 {offsets = [24, 0], sizes = [8, 128], strides = [1, 1]} : vector<32x128xf32> to vector<8x128xf32>
    %136 = arith.maximumf %132, %133 : vector<8x128xf32>
    %137 = arith.maximumf %134, %135 : vector<8x128xf32>
    %138 = arith.maximumf %136, %137 : vector<8x128xf32>
    %139 = arith.subf %132, %138 : vector<8x128xf32>
    %140 = math.exp %139 : vector<8x128xf32>
    %141 = arith.subf %133, %138 : vector<8x128xf32>
    %142 = math.exp %141 : vector<8x128xf32>
    %143 = arith.subf %134, %138 : vector<8x128xf32>
    %144 = math.exp %143 : vector<8x128xf32>
    %145 = arith.subf %135, %138 : vector<8x128xf32>
    %146 = math.exp %145 : vector<8x128xf32>
    %147 = arith.addf %140, %142 : vector<8x128xf32>
    %148 = arith.addf %147, %144 : vector<8x128xf32>
    %149 = arith.addf %148, %146 : vector<8x128xf32>
    %150 = tpu.reciprocal %149 {approx = true} : vector<8x128xf32> -> vector<8x128xf32>
    %151 = arith.mulf %140, %150 : vector<8x128xf32>
    %152 = arith.mulf %142, %150 : vector<8x128xf32>
    %153 = arith.mulf %144, %150 : vector<8x128xf32>
    %154 = arith.mulf %146, %150 : vector<8x128xf32>
    %155 = tpu.concatenate %151, %152, %153, %154 in 0 : vector<8x128xf32>, vector<8x128xf32>, vector<8x128xf32>, vector<8x128xf32> -> vector<32x128xf32>
    %cst_45 = arith.constant dense<0.000000e+00> : vector<32x32xf32>
    %156 = tpu.matmul %155, %12, %cst_45 {dimension_numbers = #tpu.dot_dimension_numbers<[1], [0], [0], [1], [0, 0, 1, 1], [], []>} : vector<32x128xf32>, vector<128x32xf32>, vector<32x32xf32> -> vector<32x32xf32>
    %157 = vector.extract_strided_slice %156 {offsets = [0, 0], sizes = [8, 32], strides = [1, 1]} : vector<32x32xf32> to vector<8x32xf32>
    %158 = arith.mulf %157, %114 : vector<8x32xf32>
    %159 = vector.extract_strided_slice %156 {offsets = [8, 0], sizes = [8, 32], strides = [1, 1]} : vector<32x32xf32> to vector<8x32xf32>
    %160 = arith.mulf %159, %116 : vector<8x32xf32>
    %161 = arith.addf %158, %160 : vector<8x32xf32>
    %162 = vector.extract_strided_slice %156 {offsets = [16, 0], sizes = [8, 32], strides = [1, 1]} : vector<32x32xf32> to vector<8x32xf32>
    %163 = arith.mulf %162, %122 : vector<8x32xf32>
    %164 = arith.addf %161, %163 : vector<8x32xf32>
    %165 = vector.extract_strided_slice %156 {offsets = [24, 0], sizes = [8, 32], strides = [1, 1]} : vector<32x32xf32> to vector<8x32xf32>
    %166 = arith.mulf %165, %123 : vector<8x32xf32>
    %167 = arith.addf %164, %166 : vector<8x32xf32>
    %cst_46 = arith.constant dense<0.000000e+00> : vector<8x32xf32>
    %168 = tpu.matmul %167, %5, %cst_46 {dimension_numbers = #tpu.dot_dimension_numbers<[1], [0], [0], [1], [0, 0, 1, 1], [], []>} : vector<8x32xf32>, vector<32x32xf32>, vector<8x32xf32> -> vector<8x32xf32>
    %169 = vector.broadcast %6 : vector<1x32xf32> to vector<8x32xf32>
    %170 = arith.addf %168, %169 : vector<8x32xf32>
    %cst_47 = arith.constant 5.000000e-01 : f32
    %171 = vector.broadcast %cst_47 : f32 to vector<8x32xf32>
    %172 = arith.mulf %171, %170 : vector<8x32xf32>
    %cst_48 = arith.constant 0.707106769 : f32
    %173 = vector.broadcast %cst_48 : f32 to vector<8x32xf32>
    %174 = arith.mulf %170, %173 : vector<8x32xf32>
    %175 = math.erf %174 : vector<8x32xf32>
    %cst_49 = arith.constant 1.000000e+00 : f32
    %176 = vector.broadcast %cst_49 : f32 to vector<8x32xf32>
    %177 = arith.addf %176, %175 : vector<8x32xf32>
    %178 = arith.mulf %172, %177 : vector<8x32xf32>
    %cst_50 = arith.constant dense<0.000000e+00> : vector<8x32xf32>
    %179 = tpu.matmul %178, %7, %cst_50 {dimension_numbers = #tpu.dot_dimension_numbers<[1], [0], [0], [1], [0, 0, 1, 1], [], []>} : vector<8x32xf32>, vector<32x32xf32>, vector<8x32xf32> -> vector<8x32xf32>
    %180 = arith.addf %121, %179 : vector<8x32xf32>
    %181 = vector.broadcast %8 : vector<1x32xf32> to vector<8x32xf32>
    %182 = arith.addf %180, %181 : vector<8x32xf32>
    %183 = arith.negf %182 : vector<8x32xf32>
    %184 = math.exp %183 : vector<8x32xf32>
    %cst_51 = arith.constant 1.000000e+00 : f32
    %185 = vector.broadcast %cst_51 : f32 to vector<8x32xf32>
    %186 = arith.addf %185, %184 : vector<8x32xf32>
    %187 = arith.divf %185, %186 : vector<8x32xf32>
    %188 = arith.addf %178, %114 : vector<8x32xf32>
    %cst_52 = arith.constant dense<0.000000e+00> : vector<8xf32>
    %189 = vector.multi_reduction <add>, %188, %cst_52 [1] : vector<8x32xf32> to vector<8xf32>
    %190 = vector.shape_cast %189 : vector<8xf32> to vector<8x1xf32>
    %cst_53 = arith.constant 3.200000e+01 : f32
    %191 = vector.broadcast %cst_53 : f32 to vector<8x1xf32>
    %192 = arith.divf %190, %191 : vector<8x1xf32>
    %193 = vector.broadcast %192 : vector<8x1xf32> to vector<8x32xf32>
    %194 = arith.subf %188, %193 : vector<8x32xf32>
    %195 = arith.mulf %194, %194 : vector<8x32xf32>
    %cst_54 = arith.constant dense<0.000000e+00> : vector<8xf32>
    %196 = vector.multi_reduction <add>, %195, %cst_54 [1] : vector<8x32xf32> to vector<8xf32>
    %197 = vector.shape_cast %196 : vector<8xf32> to vector<8x1xf32>
    %cst_55 = arith.constant 3.200000e+01 : f32
    %198 = vector.broadcast %cst_55 : f32 to vector<8x1xf32>
    %199 = arith.divf %197, %198 : vector<8x1xf32>
    %200 = vector.broadcast %192 : vector<8x1xf32> to vector<8x32xf32>
    %201 = arith.subf %188, %200 : vector<8x32xf32>
    %cst_56 = arith.constant 9.99999974E-6 : f32
    %202 = vector.broadcast %cst_56 : f32 to vector<8x1xf32>
    %203 = arith.addf %199, %202 : vector<8x1xf32>
    %204 = math.rsqrt %203 : vector<8x1xf32>
    %205 = vector.broadcast %204 : vector<8x1xf32> to vector<8x32xf32>
    %206 = arith.mulf %201, %205 : vector<8x32xf32>
    %207 = vector.broadcast %9 : vector<1x32xf32> to vector<8x32xf32>
    %208 = arith.mulf %206, %207 : vector<8x32xf32>
    %209 = vector.broadcast %10 : vector<1x32xf32> to vector<8x32xf32>
    %210 = arith.addf %208, %209 : vector<8x32xf32>
    %211 = arith.mulf %187, %210 : vector<8x32xf32>
    %cst_57 = arith.constant 1.000000e+00 : f32
    %212 = vector.broadcast %cst_57 : f32 to vector<8x32xf32>
    %213 = arith.subf %212, %187 : vector<8x32xf32>
    %214 = arith.mulf %213, %114 : vector<8x32xf32>
    %215 = arith.addf %211, %214 : vector<8x32xf32>
    %c2 = arith.constant 2 : index
    %c0_58 = arith.constant 0 : index
    %c0_59 = arith.constant 0 : index
    %216 = vector.load %arg1[%c2, %c0_58, %c0_59] : memref<4x8x32xf32, #tpu.memory_space<vmem>>, vector<1x8x32xf32>
    %217 = vector.shape_cast %216 : vector<1x8x32xf32> to vector<8x32xf32>
    %cst_60 = arith.constant dense<0.000000e+00> : vector<8x64xf32>
    %218 = tpu.matmul %215, %3, %cst_60 {dimension_numbers = #tpu.dot_dimension_numbers<[1], [0], [0], [1], [0, 0, 1, 1], [], []>} : vector<8x32xf32>, vector<32x64xf32>, vector<8x64xf32> -> vector<8x64xf32>
    %219 = vector.extract_strided_slice %218 {offsets = [0, 0], sizes = [8, 32], strides = [1, 1]} : vector<8x64xf32> to vector<8x32xf32>
    %220 = vector.broadcast %4 : vector<1x32xf32> to vector<8x32xf32>
    %221 = arith.addf %219, %220 : vector<8x32xf32>
    %222 = vector.extract_strided_slice %218 {offsets = [0, 32], sizes = [8, 32], strides = [1, 1]} : vector<8x64xf32> to vector<8x32xf32>
    %223 = arith.addf %215, %217 : vector<8x32xf32>
    %224 = arith.mulf %215, %217 : vector<8x32xf32>
    %225 = arith.mulf %221, %215 : vector<8x32xf32>
    %226 = arith.mulf %221, %217 : vector<8x32xf32>
    %227 = arith.mulf %221, %223 : vector<8x32xf32>
    %228 = arith.mulf %221, %224 : vector<8x32xf32>
    %229 = tpu.concatenate %225, %226, %227, %228 in 0 : vector<8x32xf32>, vector<8x32xf32>, vector<8x32xf32>, vector<8x32xf32> -> vector<32x32xf32>
    %cst_61 = arith.constant dense<0.000000e+00> : vector<32x128xf32>
    %230 = tpu.matmul %229, %11, %cst_61 {dimension_numbers = #tpu.dot_dimension_numbers<[1], [0], [0], [1], [0, 0, 1, 1], [], []>} : vector<32x32xf32>, vector<32x128xf32>, vector<32x128xf32> -> vector<32x128xf32>
    %cst_62 = arith.constant 0.353553385 : f32
    %231 = vector.broadcast %cst_62 : f32 to vector<32x128xf32>
    %232 = arith.mulf %230, %231 : vector<32x128xf32>
    %233 = vector.extract_strided_slice %232 {offsets = [0, 0], sizes = [8, 128], strides = [1, 1]} : vector<32x128xf32> to vector<8x128xf32>
    %234 = vector.extract_strided_slice %232 {offsets = [8, 0], sizes = [8, 128], strides = [1, 1]} : vector<32x128xf32> to vector<8x128xf32>
    %235 = vector.extract_strided_slice %232 {offsets = [16, 0], sizes = [8, 128], strides = [1, 1]} : vector<32x128xf32> to vector<8x128xf32>
    %236 = vector.extract_strided_slice %232 {offsets = [24, 0], sizes = [8, 128], strides = [1, 1]} : vector<32x128xf32> to vector<8x128xf32>
    %237 = arith.maximumf %233, %234 : vector<8x128xf32>
    %238 = arith.maximumf %235, %236 : vector<8x128xf32>
    %239 = arith.maximumf %237, %238 : vector<8x128xf32>
    %240 = arith.subf %233, %239 : vector<8x128xf32>
    %241 = math.exp %240 : vector<8x128xf32>
    %242 = arith.subf %234, %239 : vector<8x128xf32>
    %243 = math.exp %242 : vector<8x128xf32>
    %244 = arith.subf %235, %239 : vector<8x128xf32>
    %245 = math.exp %244 : vector<8x128xf32>
    %246 = arith.subf %236, %239 : vector<8x128xf32>
    %247 = math.exp %246 : vector<8x128xf32>
    %248 = arith.addf %241, %243 : vector<8x128xf32>
    %249 = arith.addf %248, %245 : vector<8x128xf32>
    %250 = arith.addf %249, %247 : vector<8x128xf32>
    %251 = tpu.reciprocal %250 {approx = true} : vector<8x128xf32> -> vector<8x128xf32>
    %252 = arith.mulf %241, %251 : vector<8x128xf32>
    %253 = arith.mulf %243, %251 : vector<8x128xf32>
    %254 = arith.mulf %245, %251 : vector<8x128xf32>
    %255 = arith.mulf %247, %251 : vector<8x128xf32>
    %256 = tpu.concatenate %252, %253, %254, %255 in 0 : vector<8x128xf32>, vector<8x128xf32>, vector<8x128xf32>, vector<8x128xf32> -> vector<32x128xf32>
    %cst_63 = arith.constant dense<0.000000e+00> : vector<32x32xf32>
    %257 = tpu.matmul %256, %12, %cst_63 {dimension_numbers = #tpu.dot_dimension_numbers<[1], [0], [0], [1], [0, 0, 1, 1], [], []>} : vector<32x128xf32>, vector<128x32xf32>, vector<32x32xf32> -> vector<32x32xf32>
    %258 = vector.extract_strided_slice %257 {offsets = [0, 0], sizes = [8, 32], strides = [1, 1]} : vector<32x32xf32> to vector<8x32xf32>
    %259 = arith.mulf %258, %215 : vector<8x32xf32>
    %260 = vector.extract_strided_slice %257 {offsets = [8, 0], sizes = [8, 32], strides = [1, 1]} : vector<32x32xf32> to vector<8x32xf32>
    %261 = arith.mulf %260, %217 : vector<8x32xf32>
    %262 = arith.addf %259, %261 : vector<8x32xf32>
    %263 = vector.extract_strided_slice %257 {offsets = [16, 0], sizes = [8, 32], strides = [1, 1]} : vector<32x32xf32> to vector<8x32xf32>
    %264 = arith.mulf %263, %223 : vector<8x32xf32>
    %265 = arith.addf %262, %264 : vector<8x32xf32>
    %266 = vector.extract_strided_slice %257 {offsets = [24, 0], sizes = [8, 32], strides = [1, 1]} : vector<32x32xf32> to vector<8x32xf32>
    %267 = arith.mulf %266, %224 : vector<8x32xf32>
    %268 = arith.addf %265, %267 : vector<8x32xf32>
    %cst_64 = arith.constant dense<0.000000e+00> : vector<8x32xf32>
    %269 = tpu.matmul %268, %5, %cst_64 {dimension_numbers = #tpu.dot_dimension_numbers<[1], [0], [0], [1], [0, 0, 1, 1], [], []>} : vector<8x32xf32>, vector<32x32xf32>, vector<8x32xf32> -> vector<8x32xf32>
    %270 = vector.broadcast %6 : vector<1x32xf32> to vector<8x32xf32>
    %271 = arith.addf %269, %270 : vector<8x32xf32>
    %cst_65 = arith.constant 5.000000e-01 : f32
    %272 = vector.broadcast %cst_65 : f32 to vector<8x32xf32>
    %273 = arith.mulf %272, %271 : vector<8x32xf32>
    %cst_66 = arith.constant 0.707106769 : f32
    %274 = vector.broadcast %cst_66 : f32 to vector<8x32xf32>
    %275 = arith.mulf %271, %274 : vector<8x32xf32>
    %276 = math.erf %275 : vector<8x32xf32>
    %cst_67 = arith.constant 1.000000e+00 : f32
    %277 = vector.broadcast %cst_67 : f32 to vector<8x32xf32>
    %278 = arith.addf %277, %276 : vector<8x32xf32>
    %279 = arith.mulf %273, %278 : vector<8x32xf32>
    %cst_68 = arith.constant dense<0.000000e+00> : vector<8x32xf32>
    %280 = tpu.matmul %279, %7, %cst_68 {dimension_numbers = #tpu.dot_dimension_numbers<[1], [0], [0], [1], [0, 0, 1, 1], [], []>} : vector<8x32xf32>, vector<32x32xf32>, vector<8x32xf32> -> vector<8x32xf32>
    %281 = arith.addf %222, %280 : vector<8x32xf32>
    %282 = vector.broadcast %8 : vector<1x32xf32> to vector<8x32xf32>
    %283 = arith.addf %281, %282 : vector<8x32xf32>
    %284 = arith.negf %283 : vector<8x32xf32>
    %285 = math.exp %284 : vector<8x32xf32>
    %cst_69 = arith.constant 1.000000e+00 : f32
    %286 = vector.broadcast %cst_69 : f32 to vector<8x32xf32>
    %287 = arith.addf %286, %285 : vector<8x32xf32>
    %288 = arith.divf %286, %287 : vector<8x32xf32>
    %289 = arith.addf %279, %215 : vector<8x32xf32>
    %cst_70 = arith.constant dense<0.000000e+00> : vector<8xf32>
    %290 = vector.multi_reduction <add>, %289, %cst_70 [1] : vector<8x32xf32> to vector<8xf32>
    %291 = vector.shape_cast %290 : vector<8xf32> to vector<8x1xf32>
    %cst_71 = arith.constant 3.200000e+01 : f32
    %292 = vector.broadcast %cst_71 : f32 to vector<8x1xf32>
    %293 = arith.divf %291, %292 : vector<8x1xf32>
    %294 = vector.broadcast %293 : vector<8x1xf32> to vector<8x32xf32>
    %295 = arith.subf %289, %294 : vector<8x32xf32>
    %296 = arith.mulf %295, %295 : vector<8x32xf32>
    %cst_72 = arith.constant dense<0.000000e+00> : vector<8xf32>
    %297 = vector.multi_reduction <add>, %296, %cst_72 [1] : vector<8x32xf32> to vector<8xf32>
    %298 = vector.shape_cast %297 : vector<8xf32> to vector<8x1xf32>
    %cst_73 = arith.constant 3.200000e+01 : f32
    %299 = vector.broadcast %cst_73 : f32 to vector<8x1xf32>
    %300 = arith.divf %298, %299 : vector<8x1xf32>
    %301 = vector.broadcast %293 : vector<8x1xf32> to vector<8x32xf32>
    %302 = arith.subf %289, %301 : vector<8x32xf32>
    %cst_74 = arith.constant 9.99999974E-6 : f32
    %303 = vector.broadcast %cst_74 : f32 to vector<8x1xf32>
    %304 = arith.addf %300, %303 : vector<8x1xf32>
    %305 = math.rsqrt %304 : vector<8x1xf32>
    %306 = vector.broadcast %305 : vector<8x1xf32> to vector<8x32xf32>
    %307 = arith.mulf %302, %306 : vector<8x32xf32>
    %308 = vector.broadcast %9 : vector<1x32xf32> to vector<8x32xf32>
    %309 = arith.mulf %307, %308 : vector<8x32xf32>
    %310 = vector.broadcast %10 : vector<1x32xf32> to vector<8x32xf32>
    %311 = arith.addf %309, %310 : vector<8x32xf32>
    %312 = arith.mulf %288, %311 : vector<8x32xf32>
    %cst_75 = arith.constant 1.000000e+00 : f32
    %313 = vector.broadcast %cst_75 : f32 to vector<8x32xf32>
    %314 = arith.subf %313, %288 : vector<8x32xf32>
    %315 = arith.mulf %314, %215 : vector<8x32xf32>
    %316 = arith.addf %312, %315 : vector<8x32xf32>
    %c3 = arith.constant 3 : index
    %c0_76 = arith.constant 0 : index
    %c0_77 = arith.constant 0 : index
    %317 = vector.load %arg1[%c3, %c0_76, %c0_77] : memref<4x8x32xf32, #tpu.memory_space<vmem>>, vector<1x8x32xf32>
    %318 = vector.shape_cast %317 : vector<1x8x32xf32> to vector<8x32xf32>
    %cst_78 = arith.constant dense<0.000000e+00> : vector<8x64xf32>
    %319 = tpu.matmul %316, %3, %cst_78 {dimension_numbers = #tpu.dot_dimension_numbers<[1], [0], [0], [1], [0, 0, 1, 1], [], []>} : vector<8x32xf32>, vector<32x64xf32>, vector<8x64xf32> -> vector<8x64xf32>
    %320 = vector.extract_strided_slice %319 {offsets = [0, 0], sizes = [8, 32], strides = [1, 1]} : vector<8x64xf32> to vector<8x32xf32>
    %321 = vector.broadcast %4 : vector<1x32xf32> to vector<8x32xf32>
    %322 = arith.addf %320, %321 : vector<8x32xf32>
    %323 = vector.extract_strided_slice %319 {offsets = [0, 32], sizes = [8, 32], strides = [1, 1]} : vector<8x64xf32> to vector<8x32xf32>
    %324 = arith.addf %316, %318 : vector<8x32xf32>
    %325 = arith.mulf %316, %318 : vector<8x32xf32>
    %326 = arith.mulf %322, %316 : vector<8x32xf32>
    %327 = arith.mulf %322, %318 : vector<8x32xf32>
    %328 = arith.mulf %322, %324 : vector<8x32xf32>
    %329 = arith.mulf %322, %325 : vector<8x32xf32>
    %330 = tpu.concatenate %326, %327, %328, %329 in 0 : vector<8x32xf32>, vector<8x32xf32>, vector<8x32xf32>, vector<8x32xf32> -> vector<32x32xf32>
    %cst_79 = arith.constant dense<0.000000e+00> : vector<32x128xf32>
    %331 = tpu.matmul %330, %11, %cst_79 {dimension_numbers = #tpu.dot_dimension_numbers<[1], [0], [0], [1], [0, 0, 1, 1], [], []>} : vector<32x32xf32>, vector<32x128xf32>, vector<32x128xf32> -> vector<32x128xf32>
    %cst_80 = arith.constant 0.353553385 : f32
    %332 = vector.broadcast %cst_80 : f32 to vector<32x128xf32>
    %333 = arith.mulf %331, %332 : vector<32x128xf32>
    %334 = vector.extract_strided_slice %333 {offsets = [0, 0], sizes = [8, 128], strides = [1, 1]} : vector<32x128xf32> to vector<8x128xf32>
    %335 = vector.extract_strided_slice %333 {offsets = [8, 0], sizes = [8, 128], strides = [1, 1]} : vector<32x128xf32> to vector<8x128xf32>
    %336 = vector.extract_strided_slice %333 {offsets = [16, 0], sizes = [8, 128], strides = [1, 1]} : vector<32x128xf32> to vector<8x128xf32>
    %337 = vector.extract_strided_slice %333 {offsets = [24, 0], sizes = [8, 128], strides = [1, 1]} : vector<32x128xf32> to vector<8x128xf32>
    %338 = arith.maximumf %334, %335 : vector<8x128xf32>
    %339 = arith.maximumf %336, %337 : vector<8x128xf32>
    %340 = arith.maximumf %338, %339 : vector<8x128xf32>
    %341 = arith.subf %334, %340 : vector<8x128xf32>
    %342 = math.exp %341 : vector<8x128xf32>
    %343 = arith.subf %335, %340 : vector<8x128xf32>
    %344 = math.exp %343 : vector<8x128xf32>
    %345 = arith.subf %336, %340 : vector<8x128xf32>
    %346 = math.exp %345 : vector<8x128xf32>
    %347 = arith.subf %337, %340 : vector<8x128xf32>
    %348 = math.exp %347 : vector<8x128xf32>
    %349 = arith.addf %342, %344 : vector<8x128xf32>
    %350 = arith.addf %349, %346 : vector<8x128xf32>
    %351 = arith.addf %350, %348 : vector<8x128xf32>
    %352 = tpu.reciprocal %351 {approx = true} : vector<8x128xf32> -> vector<8x128xf32>
    %353 = arith.mulf %342, %352 : vector<8x128xf32>
    %354 = arith.mulf %344, %352 : vector<8x128xf32>
    %355 = arith.mulf %346, %352 : vector<8x128xf32>
    %356 = arith.mulf %348, %352 : vector<8x128xf32>
    %357 = tpu.concatenate %353, %354, %355, %356 in 0 : vector<8x128xf32>, vector<8x128xf32>, vector<8x128xf32>, vector<8x128xf32> -> vector<32x128xf32>
    %cst_81 = arith.constant dense<0.000000e+00> : vector<32x32xf32>
    %358 = tpu.matmul %357, %12, %cst_81 {dimension_numbers = #tpu.dot_dimension_numbers<[1], [0], [0], [1], [0, 0, 1, 1], [], []>} : vector<32x128xf32>, vector<128x32xf32>, vector<32x32xf32> -> vector<32x32xf32>
    %359 = vector.extract_strided_slice %358 {offsets = [0, 0], sizes = [8, 32], strides = [1, 1]} : vector<32x32xf32> to vector<8x32xf32>
    %360 = arith.mulf %359, %316 : vector<8x32xf32>
    %361 = vector.extract_strided_slice %358 {offsets = [8, 0], sizes = [8, 32], strides = [1, 1]} : vector<32x32xf32> to vector<8x32xf32>
    %362 = arith.mulf %361, %318 : vector<8x32xf32>
    %363 = arith.addf %360, %362 : vector<8x32xf32>
    %364 = vector.extract_strided_slice %358 {offsets = [16, 0], sizes = [8, 32], strides = [1, 1]} : vector<32x32xf32> to vector<8x32xf32>
    %365 = arith.mulf %364, %324 : vector<8x32xf32>
    %366 = arith.addf %363, %365 : vector<8x32xf32>
    %367 = vector.extract_strided_slice %358 {offsets = [24, 0], sizes = [8, 32], strides = [1, 1]} : vector<32x32xf32> to vector<8x32xf32>
    %368 = arith.mulf %367, %325 : vector<8x32xf32>
    %369 = arith.addf %366, %368 : vector<8x32xf32>
    %cst_82 = arith.constant dense<0.000000e+00> : vector<8x32xf32>
    %370 = tpu.matmul %369, %5, %cst_82 {dimension_numbers = #tpu.dot_dimension_numbers<[1], [0], [0], [1], [0, 0, 1, 1], [], []>} : vector<8x32xf32>, vector<32x32xf32>, vector<8x32xf32> -> vector<8x32xf32>
    %371 = vector.broadcast %6 : vector<1x32xf32> to vector<8x32xf32>
    %372 = arith.addf %370, %371 : vector<8x32xf32>
    %cst_83 = arith.constant 5.000000e-01 : f32
    %373 = vector.broadcast %cst_83 : f32 to vector<8x32xf32>
    %374 = arith.mulf %373, %372 : vector<8x32xf32>
    %cst_84 = arith.constant 0.707106769 : f32
    %375 = vector.broadcast %cst_84 : f32 to vector<8x32xf32>
    %376 = arith.mulf %372, %375 : vector<8x32xf32>
    %377 = math.erf %376 : vector<8x32xf32>
    %cst_85 = arith.constant 1.000000e+00 : f32
    %378 = vector.broadcast %cst_85 : f32 to vector<8x32xf32>
    %379 = arith.addf %378, %377 : vector<8x32xf32>
    %380 = arith.mulf %374, %379 : vector<8x32xf32>
    %cst_86 = arith.constant dense<0.000000e+00> : vector<8x32xf32>
    %381 = tpu.matmul %380, %7, %cst_86 {dimension_numbers = #tpu.dot_dimension_numbers<[1], [0], [0], [1], [0, 0, 1, 1], [], []>} : vector<8x32xf32>, vector<32x32xf32>, vector<8x32xf32> -> vector<8x32xf32>
    %382 = arith.addf %323, %381 : vector<8x32xf32>
    %383 = vector.broadcast %8 : vector<1x32xf32> to vector<8x32xf32>
    %384 = arith.addf %382, %383 : vector<8x32xf32>
    %385 = arith.negf %384 : vector<8x32xf32>
    %386 = math.exp %385 : vector<8x32xf32>
    %cst_87 = arith.constant 1.000000e+00 : f32
    %387 = vector.broadcast %cst_87 : f32 to vector<8x32xf32>
    %388 = arith.addf %387, %386 : vector<8x32xf32>
    %389 = arith.divf %387, %388 : vector<8x32xf32>
    %390 = arith.addf %380, %316 : vector<8x32xf32>
    %cst_88 = arith.constant dense<0.000000e+00> : vector<8xf32>
    %391 = vector.multi_reduction <add>, %390, %cst_88 [1] : vector<8x32xf32> to vector<8xf32>
    %392 = vector.shape_cast %391 : vector<8xf32> to vector<8x1xf32>
    %cst_89 = arith.constant 3.200000e+01 : f32
    %393 = vector.broadcast %cst_89 : f32 to vector<8x1xf32>
    %394 = arith.divf %392, %393 : vector<8x1xf32>
    %395 = vector.broadcast %394 : vector<8x1xf32> to vector<8x32xf32>
    %396 = arith.subf %390, %395 : vector<8x32xf32>
    %397 = arith.mulf %396, %396 : vector<8x32xf32>
    %cst_90 = arith.constant dense<0.000000e+00> : vector<8xf32>
    %398 = vector.multi_reduction <add>, %397, %cst_90 [1] : vector<8x32xf32> to vector<8xf32>
    %399 = vector.shape_cast %398 : vector<8xf32> to vector<8x1xf32>
    %cst_91 = arith.constant 3.200000e+01 : f32
    %400 = vector.broadcast %cst_91 : f32 to vector<8x1xf32>
    %401 = arith.divf %399, %400 : vector<8x1xf32>
    %402 = vector.broadcast %394 : vector<8x1xf32> to vector<8x32xf32>
    %403 = arith.subf %390, %402 : vector<8x32xf32>
    %cst_92 = arith.constant 9.99999974E-6 : f32
    %404 = vector.broadcast %cst_92 : f32 to vector<8x1xf32>
    %405 = arith.addf %401, %404 : vector<8x1xf32>
    %406 = math.rsqrt %405 : vector<8x1xf32>
    %407 = vector.broadcast %406 : vector<8x1xf32> to vector<8x32xf32>
    %408 = arith.mulf %403, %407 : vector<8x32xf32>
    %409 = vector.broadcast %9 : vector<1x32xf32> to vector<8x32xf32>
    %410 = arith.mulf %408, %409 : vector<8x32xf32>
    %411 = vector.broadcast %10 : vector<1x32xf32> to vector<8x32xf32>
    %412 = arith.addf %410, %411 : vector<8x32xf32>
    %413 = arith.mulf %389, %412 : vector<8x32xf32>
    %cst_93 = arith.constant 1.000000e+00 : f32
    %414 = vector.broadcast %cst_93 : f32 to vector<8x32xf32>
    %415 = arith.subf %414, %389 : vector<8x32xf32>
    %416 = arith.mulf %415, %316 : vector<8x32xf32>
    %417 = arith.addf %413, %416 : vector<8x32xf32>
    %c0_94 = arith.constant 0 : index
    %c0_95 = arith.constant 0 : index
    %418 = vector.load %arg16[%c0_94, %c0_95] : memref<8x32xf32, #tpu.memory_space<vmem>>, vector<8x32xf32>
    tpu.vector_store %arg16[%c0_94, %c0_95], %417 {strides = array<i32>} : memref<8x32xf32, #tpu.memory_space<vmem>>, vector<8x32xf32>,
    %c1_i32 = arith.constant 1 : i32
    %419 = arith.cmpi eq, %arg0, %c1_i32 : i32
    %420 = arith.extui %419 : i1 to i32
    %c0_i32_96 = arith.constant 0 : i32
    %421 = arith.cmpi ne, %420, %c0_i32_96 : i32
    scf.if %421 {
      %c0_97 = arith.constant 0 : index
      %c0_98 = arith.constant 0 : index
      %422 = vector.load %arg15[%c0_97, %c0_98] : memref<8x32xf32, #tpu.memory_space<vmem>>, vector<8x32xf32>
      tpu.vector_store %arg15[%c0_97, %c0_98], %417 {strides = array<i32>} : memref<8x32xf32, #tpu.memory_space<vmem>>, vector<8x32xf32>,
      %c0_99 = arith.constant 0 : index
      %c0_100 = arith.constant 0 : index
      %423 = vector.load %arg10[%c0_99, %c0_100] : memref<32x2xf32, #tpu.memory_space<vmem>>, vector<32x2xf32>
      %cst_101 = arith.constant dense<0.000000e+00> : vector<8x2xf32>
      %424 = tpu.matmul %417, %423, %cst_101 {dimension_numbers = #tpu.dot_dimension_numbers<[1], [0], [0], [1], [0, 0, 1, 1], [], []>} : vector<8x32xf32>, vector<32x2xf32>, vector<8x2xf32> -> vector<8x2xf32>
      %c0_102 = arith.constant 0 : index
      %c0_103 = arith.constant 0 : index
      %425 = vector.load %arg11[%c0_102, %c0_103] : memref<1x2xf32, #tpu.memory_space<vmem>>, vector<1x2xf32>
      %426 = vector.broadcast %425 : vector<1x2xf32> to vector<8x2xf32>
      %427 = arith.addf %424, %426 : vector<8x2xf32>
      %c0_104 = arith.constant 0 : index
      %c0_105 = arith.constant 0 : index
      %428 = vector.load %arg14[%c0_104, %c0_105] : memref<8x2xf32, #tpu.memory_space<vmem>>, vector<8x2xf32>
      tpu.vector_store %arg14[%c0_104, %c0_105], %427 {strides = array<i32>} : memref<8x2xf32, #tpu.memory_space<vmem>>, vector<8x2xf32>,
    } else {
    }
    return
  }
  func.func @transform_0(%arg0: i32) -> (i32, i32, i32) {
    %c0_i32 = arith.constant 0 : i32
    %c0_i32_0 = arith.constant 0 : i32
    %c0_i32_1 = arith.constant 0 : i32
    return %arg0, %c0_i32, %c0_i32_0 : i32, i32, i32
  }
  func.func @transform_1(%arg0: i32) -> (i32, i32) {
    %c0_i32 = arith.constant 0 : i32
    %c0_i32_0 = arith.constant 0 : i32
    %c0_i32_1 = arith.constant 0 : i32
    return %c0_i32, %c0_i32_0 : i32, i32
  }
  func.func @transform_2(%arg0: i32) -> (i32, i32) {
    %c0_i32 = arith.constant 0 : i32
    %c0_i32_0 = arith.constant 0 : i32
    %c0_i32_1 = arith.constant 0 : i32
    return %c0_i32, %c0_i32_0 : i32, i32
  }
  func.func @transform_3(%arg0: i32) -> (i32, i32) {
    %c0_i32 = arith.constant 0 : i32
    %c0_i32_0 = arith.constant 0 : i32
    %c0_i32_1 = arith.constant 0 : i32
    return %c0_i32, %c0_i32_0 : i32, i32
  }
  func.func @transform_4(%arg0: i32) -> (i32, i32) {
    %c0_i32 = arith.constant 0 : i32
    %c0_i32_0 = arith.constant 0 : i32
    %c0_i32_1 = arith.constant 0 : i32
    return %c0_i32, %c0_i32_0 : i32, i32
  }
  func.func @transform_5(%arg0: i32) -> (i32, i32) {
    %c0_i32 = arith.constant 0 : i32
    %c0_i32_0 = arith.constant 0 : i32
    %c0_i32_1 = arith.constant 0 : i32
    return %c0_i32, %c0_i32_0 : i32, i32
  }
  func.func @transform_6(%arg0: i32) -> (i32, i32) {
    %c0_i32 = arith.constant 0 : i32
    %c0_i32_0 = arith.constant 0 : i32
    %c0_i32_1 = arith.constant 0 : i32
    return %c0_i32, %c0_i32_0 : i32, i32
  }
  func.func @transform_7(%arg0: i32) -> (i32, i32) {
    %c0_i32 = arith.constant 0 : i32
    %c0_i32_0 = arith.constant 0 : i32
    %c0_i32_1 = arith.constant 0 : i32
    return %c0_i32, %c0_i32_0 : i32, i32
  }
  func.func @transform_8(%arg0: i32) -> (i32, i32) {
    %c0_i32 = arith.constant 0 : i32
    %c0_i32_0 = arith.constant 0 : i32
    %c0_i32_1 = arith.constant 0 : i32
    return %c0_i32, %c0_i32_0 : i32, i32
  }
  func.func @transform_9(%arg0: i32) -> (i32, i32) {
    %c0_i32 = arith.constant 0 : i32
    %c0_i32_0 = arith.constant 0 : i32
    %c0_i32_1 = arith.constant 0 : i32
    return %c0_i32, %c0_i32_0 : i32, i32
  }
  func.func @transform_10(%arg0: i32) -> (i32, i32) {
    %c0_i32 = arith.constant 0 : i32
    %c0_i32_0 = arith.constant 0 : i32
    %c0_i32_1 = arith.constant 0 : i32
    return %c0_i32, %c0_i32_0 : i32, i32
  }
  func.func @transform_11(%arg0: i32) -> (i32, i32) {
    %c0_i32 = arith.constant 0 : i32
    %c0_i32_0 = arith.constant 0 : i32
    %c0_i32_1 = arith.constant 0 : i32
    return %c0_i32, %c0_i32_0 : i32, i32
  }
  func.func @transform_12(%arg0: i32) -> (i32, i32) {
    %c0_i32 = arith.constant 0 : i32
    %c0_i32_0 = arith.constant 0 : i32
    %c0_i32_1 = arith.constant 0 : i32
    return %c0_i32, %c0_i32_0 : i32, i32
  }
  func.func @transform_13(%arg0: i32) -> (i32, i32) {
    %c0_i32 = arith.constant 0 : i32
    %c0_i32_0 = arith.constant 0 : i32
    %c0_i32_1 = arith.constant 0 : i32
    return %c0_i32, %c0_i32_0 : i32, i32
  }
  func.func @transform_14(%arg0: i32) -> (i32, i32) {
    %c0_i32 = arith.constant 0 : i32
    %c0_i32_0 = arith.constant 0 : i32
    %c0_i32_1 = arith.constant 0 : i32
    return %c0_i32, %c0_i32_0 : i32, i32
  }
}

</mosaic_0001>

<bundles_post_ra>
// kernel: tpu_custom_call.1
= control target key start
LH: loop header
LB: loop body
LE: loop exit
PB: predicated region body
PF: predicated region fallthrough
CT: control target
= control target key end

     0   :  { %s4737_s0 = inlined_call_operand.vmem [shape: f32[8,8,32], index: 0, kind: input, shape index: {}]   ;;  %s4738_s1 = inlined_call_operand.vmem [shape: f32[32,64], index: 1, kind: input, shape index: {}]   ;;  %s4739_s2 = inlined_call_operand.hbm [shape: f32[1,32], index: 2, kind: input, shape index: {}]   ;;  %s4740_s3 = inlined_call_operand.vmem [shape: f32[32,32], index: 3, kind: input, shape index: {}]   ;;  %s4741_s4 = inlined_call_operand.hbm [shape: f32[1,32], index: 4, kind: input, shape index: {}]   ;;  %s4742_s5 = inlined_call_operand.vmem [shape: f32[32,32], index: 5, kind: input, shape index: {}]   ;;  %s4743_s6 = inlined_call_operand.hbm [shape: f32[1,32], index: 6, kind: input, shape index: {}]   ;;  %s4744_s7 = inlined_call_operand.hbm [shape: f32[1,32], index: 7, kind: input, shape index: {}]   ;;  %s4745_s8 = inlined_call_operand.hbm [shape: f32[1,32], index: 8, kind: input, shape index: {}]   ;;  %s4746_s9 = inlined_call_operand.vmem [shape: f32[32,2], index: 9, kind: input, shape index: {}]   ;;  %s4747_s10 = inlined_call_operand.vmem [shape: f32[1,2], index: 10, kind: input, shape index: {}]   ;;  %s4748_s11 = inlined_call_operand.vmem [shape: f32[32,128], index: 11, kind: input, shape index: {}]   ;;  %s4749_s12 = inlined_call_operand.vmem [shape: f32[128,32], index: 12, kind: input, shape index: {}]   ;;  %s4750_s13 = inlined_call_operand.vmem [shape: f32[8,2], index: 13, kind: output, shape index: {0}]   ;;  %s4751_s14 = inlined_call_operand.hbm [shape: f32[8,32], index: 14, kind: output, shape index: {1}]  }
   0x1   :  { %4756 = sst [smem:[#allocation18_spill]] %s4751_s14 }
   0x2   :  { %20 = vsyncpa [#allocation4], 0 }
   0x3   :  { %21 = vsyncpa [#allocation7], 0 }
   0x4   :  { %22 = vsyncpa [#allocation10], 0 }
   0x5   :  { %23 = vsyncpa [#allocation5], 0  ;;  %s4037_s29 = smov 0  }
   0x6 LB: > { %4757 = sst [smem:[#allocation17_spill]] %s3945_s29  ;;  %s3947_s30 = smov [#allocation6]   ;;  %s3945_s29 = sphi %s4037_s29, %s29_s29  }
   0x7   : > { %s384_s15 = sshll.u32 %s3947_s30, 4  ;;  %s4043_s16 = sadd.s32 4294967295, %s3945_s29   ;;  %s4049_s15 = int_to_ptr.vmem [resolvable:$true] %s384_s15 }
   0x8   : > { %p2780_p0 = scmp.ge.s32.totalorder %s3945_s29, 1  ;;  %p354_p1 = scmp.lt.s32.totalorder %s3945_s29, 3 }
   0x9   : > { %p4754_p3 = scmp.eq.s32.totalorder %s4043_s16, 0  ;;  %s3948_s18 = smov [#allocation9]  }
   0xa   : > { %p4051_p4 = pnand %p2780_p0, %p354_p1  ;;  %s409_s19 = sshll.u32 %s3948_s18, 4  ;;  %s4057_s19 = int_to_ptr.vmem [resolvable:$true] %s409_s19 }
   0xb   : > { %s3949_s20 = smov [#allocation3]   ;;  %s3950_s23 = smov [#allocation8]  }
   0xc   : > { %s4758_s17 = scalar_select %p4051_p4, 1, 0 }
   0xd   : > { %p3633_p5 = pneg %p4051_p4  ;;  %s370_s21 = sshll.u32 %s3949_s20, 4  ;;  %s4065_s21 = int_to_ptr.vmem [resolvable:$true] %s370_s21 }
   0xe   : > { %s398_s24 = sshll.u32 %s3950_s23, 4  ;;  %s3757_s27 = scalar_lea.hbm %s4741_s4, 16  ;;  %s4067_s24 = int_to_ptr.vmem [resolvable:$true] %s398_s24 }
   0xf   : > { %p4061_p6 = pnand %p4754_p3, %p3633_p5  ;;  %p3758_p7 = scmp.ne.s32.totalorder %s4741_s4, %s3757_s27 }
  0x10   : > { %p3764_p11 = scmp.lt.u32.totalorder %s3757_s27, %s4741_s4 }
  0x11   : > { %p4077_p8 = pneg %p4061_p6 }
  0x13   : > { %p3760_p9 = pnand %p4077_p8, %p3758_p7 }
  0x15   : > { %p3761_p10 = pneg %p3760_p9 }
  0x17   : > { %p3766_p12 = pnand %p3764_p11, %p3761_p10 }
  0x19   : > { %3769 = shalt.err (!%p3766_p12)
}
  0x1a   : > { %s3770_s25 = scalar_lea.vmem %s4049_s15, 16  ;;  %s3777_s26 = scalar_lea.vmem %s4049_s15, 32 }
  0x1b   : > { %p3771_p13 = scmp.ne.s32.totalorder %s4049_s15, %s3770_s25  ;;  %p3778_p5 = scmp.lt.s32.totalorder %s4049_s15, %s4049_s15 }
  0x1c   : > { %p3779_p7 = scmp.lt.s32.totalorder %s3777_s26, %s3770_s25 }
  0x1d   : > { %p3773_p0 = pnand %p3771_p13, %p4077_p8 }
  0x1e   : > { %p3780_p9 = por %p3779_p7, %p3778_p5 }
  0x1f   : > { %p3774_p1 = pneg %p3773_p0 }
  0x21   : > { %p3781_p2 = pnand %p3780_p9, %p3774_p1 }
  0x23   : > { %3784 = shalt.err (!%p3781_p2)
}
  0x24   : > { %3639 = dma.hbm_to_vmem [thread:$0]  (!%p4061_p6), %s4741_s4, 16, %s4049_s15, [#allocation7]  }
  0x25   : > { %s3785_s23 = scalar_lea.hbm %s4744_s7, 16 }
  0x26   : > { %p3786_p10 = scmp.ne.s32.totalorder %s4744_s7, %s3785_s23  ;;  %p3792_p2 = scmp.lt.u32.totalorder %s3785_s23, %s4744_s7 }
  0x28   : > { %p3788_p11 = pnand %p3786_p10, %p4077_p8 }
  0x2a   : > { %p3789_p12 = pneg %p3788_p11 }
  0x2c   : > { %p3794_p13 = pnand %p3792_p2, %p3789_p12 }
  0x2e   : > { %3797 = shalt.err (!%p3794_p13)
}
  0x2f   : > { %s3798_s15 = scalar_lea.vmem %s4057_s19, 16  ;;  %s3805_s14 = scalar_lea.vmem %s4057_s19, 32 }
  0x30   : > { %p3799_p0 = scmp.ne.s32.totalorder %s4057_s19, %s3798_s15  ;;  %p3806_p7 = scmp.lt.s32.totalorder %s4057_s19, %s4057_s19 }
  0x31   : > { %p3807_p9 = scmp.lt.s32.totalorder %s3805_s14, %s3798_s15 }
  0x32   : > { %p3801_p1 = pnand %p3799_p0, %p4077_p8 }
  0x33   : > { %p3808_p10 = por %p3807_p9, %p3806_p7 }
  0x34   : > { %p3802_p5 = pneg %p3801_p1 }
  0x36   : > { %p3809_p11 = pnand %p3808_p10, %p3802_p5 }
  0x38   : > { %3812 = shalt.err (!%p3809_p11)
}
  0x39   : > { %3645 = dma.hbm_to_vmem [thread:$0]  (!%p4061_p6), %s4744_s7, 16, %s4057_s19, [#allocation10]  }
  0x3a   : > { %s3813_s20 = scalar_lea.hbm %s4739_s2, 16 }
  0x3b   : > { %p3814_p12 = scmp.ne.s32.totalorder %s4739_s2, %s3813_s20  ;;  %p3820_p0 = scmp.lt.u32.totalorder %s3813_s20, %s4739_s2 }
  0x3d   : > { %p3816_p2 = pnand %p3814_p12, %p4077_p8 }
  0x3f   : > { %p3817_p13 = pneg %p3816_p2 }
  0x41   : > { %p3822_p1 = pnand %p3820_p0, %p3817_p13 }
  0x43   : > { %3825 = shalt.err (!%p3822_p1)
}
  0x44   : > { %s3826_s19 = scalar_lea.vmem %s4065_s21, 16  ;;  %s3833_s14 = scalar_lea.vmem %s4065_s21, 32 }
  0x45   : > { %p3827_p5 = scmp.ne.s32.totalorder %s4065_s21, %s3826_s19  ;;  %p3834_p10 = scmp.lt.s32.totalorder %s4065_s21, %s4065_s21 }
  0x46   : > { %p3835_p11 = scmp.lt.s32.totalorder %s3833_s14, %s3826_s19 }
  0x47   : > { %p3829_p7 = pnand %p3827_p5, %p4077_p8 }
  0x48   : > { %p3836_p12 = por %p3835_p11, %p3834_p10 }
  0x49   : > { %p3830_p9 = pneg %p3829_p7 }
  0x4b   : > { %p3837_p2 = pnand %p3836_p12, %p3830_p9 }
  0x4d   : > { %3840 = shalt.err (!%p3837_p2)
}
  0x4e   : > { %3636 = dma.hbm_to_vmem [thread:$0]  (!%p4061_p6), %s4739_s2, 16, %s4065_s21, [#allocation4]  }
  0x4f   : > { %s3841_s20 = scalar_lea.hbm %s4743_s6, 16 }
  0x50   : > { %p3842_p13 = scmp.ne.s32.totalorder %s4743_s6, %s3841_s20  ;;  %p3848_p5 = scmp.lt.u32.totalorder %s3841_s20, %s4743_s6 }
  0x52   : > { %p3844_p0 = pnand %p3842_p13, %p4077_p8 }
  0x54   : > { %p3845_p1 = pneg %p3844_p0 }
  0x56   : > { %p3850_p7 = pnand %p3848_p5, %p3845_p1 }
  0x58   : > { %3853 = shalt.err (!%p3850_p7)
}
  0x59   : > { %s3854_s21 = scalar_lea.vmem %s4067_s24, 16  ;;  %s3861_s19 = scalar_lea.vmem %s4067_s24, 32 }
  0x5a   : > { %p3855_p9 = scmp.ne.s32.totalorder %s4067_s24, %s3854_s21  ;;  %p3862_p12 = scmp.lt.s32.totalorder %s4067_s24, %s4067_s24 }
  0x5b   : > { %p3863_p2 = scmp.lt.s32.totalorder %s3861_s19, %s3854_s21 }
  0x5c   : > { %p3857_p10 = pnand %p3855_p9, %p4077_p8 }
  0x5d   : > { %p3864_p13 = por %p3863_p2, %p3862_p12 }
  0x5e   : > { %p3858_p11 = pneg %p3857_p10 }
  0x60   : > { %p3865_p0 = pnand %p3864_p13, %p3858_p11 }
  0x62   : > { %3868 = shalt.err (!%p3865_p0)
}
  0x63   : > { %3642 = dma.hbm_to_vmem [thread:$0]  (!%p4061_p6), %s4743_s6, 16, %s4067_s24, [#allocation7]  }
  0x64   : > { %s3951_s27 = smov [#allocation11]   ;;  %s3869_s23 = scalar_lea.hbm %s4745_s8, 16 }
  0x65   : > { %s420_s28 = sshll.u32 %s3951_s27, 4  ;;  %p3870_p1 = scmp.ne.s32.totalorder %s4745_s8, %s3869_s23  ;;  %s421_s28 = int_to_ptr.vmem [resolvable:$true] %s420_s28 }
  0x66   : > { %p3876_p9 = scmp.lt.u32.totalorder %s3869_s23, %s4745_s8 }
  0x67   : > { %p3872_p5 = pnand %p3870_p1, %p4077_p8 }
  0x69   : > { %p3873_p7 = pneg %p3872_p5 }
  0x6b   : > { %p3878_p10 = pnand %p3876_p9, %p3873_p7 }
  0x6d   : > { %3881 = shalt.err (!%p3878_p10)
}
  0x6e   : > { %s3882_s24 = scalar_lea.vmem %s421_s28, 16  ;;  %s3889_s19 = scalar_lea.vmem %s421_s28, 32 }
  0x6f   : > { %p3883_p11 = scmp.ne.s32.totalorder %s421_s28, %s3882_s24  ;;  %p3890_p13 = scmp.lt.s32.totalorder %s421_s28, %s421_s28 }
  0x70   : > { %p3891_p0 = scmp.lt.s32.totalorder %s3889_s19, %s3882_s24 }
  0x71   : > { %p3885_p12 = pnand %p3883_p11, %p4077_p8 }
  0x72   : > { %p3892_p3 = por %p3891_p0, %p3890_p13 }
  0x73   : > { %p3886_p2 = pneg %p3885_p12 }
  0x75   : > { %p3893_p4 = pnand %p3892_p3, %p3886_p2 }
  0x77   : > { %3896 = shalt.err (!%p3893_p4)
}
  0x78   : > { %3648 = dma.hbm_to_vmem [thread:$0]  (!%p4061_p6), %s4745_s8, 16, %s421_s28, [#allocation10]  }
  0x79   : > { %p4761_p1 = scmp.ne.s32.totalorder %s4758_s17, 0 }
  0x7a   : > { %p4762_p5 = scmp.eq.s32.totalorder (!%p4761_p1), %s4043_s16, 0 }
  0x7b   : > { %454 = sbr.rel (%p4761_p1) target bundleno = 6319 (0x18af), region = 72 }
  0x82   : > { %3928 = dma.done.wait (%p4762_p5), [#allocation4], 16   ;;  %p4763_p8 = pmov %p4762_p5 }
  0x83   : > { %p4764_p7 = pmov %p4762_p5 }
  0x84   : > { %3930 = vsyncadd (%p4763_p8), [#allocation4], 4294967280 }
  0x85   : > { %3932 = dma.done.wait (%p4764_p7), [#allocation7], 32   ;;  %p4765_p3 = pmov %p4762_p5 }
  0x87   : > { %3934 = vsyncadd (%p4765_p3), [#allocation7], 4294967264  ;;  %p4766_p4 = pmov %p4765_p3 }
  0x88   : > { %p4767_p6 = pmov %p4765_p3 }
  0x89   : > { %3936 = dma.done.wait (%p4766_p4), [#allocation10], 32  }
  0x8a   : > { %3938 = vsyncadd (%p4767_p6), [#allocation10], 4294967264  ;;  %s2793_s17 = sshll.u32 %s4043_s16, 2  ;;  %p4768_p10 = scmp.ne.s32.totalorder %s4043_s16, 0 }
  0x8b   : > { %p512_p9 = scmp.lt.s32.totalorder %s2793_s17, 7  ;;  %vm521_vm0 = vcmask (!%p4768_p10), 261120   ;;  %v3952_v0 = vmov (!%p4768_p10), 0.001  }
  0x8c   : > { %520 = sbr.rel (%p4768_p10) target bundleno = 147 (0x93), region = 96  ;;  %522 = vst.msk [vmem:[#allocation2] sm:$0xff] (!%p4768_p10), %vm521_vm0, %v3952_v0 }
  0x8d   : > { %s4772_s17 = smov (!%p512_p9, %s2793_s17), 7 }
  0x8e   : > { %s2794_s22 = sshll.u32 %s4772_s17, 3 }
  0x8f   : > { %s4207_s28 = scalar_lea.vmem %s4737_s0, %s2794_s22 }
  0x93 PF: > { %v523_v1 = vld [vmem:[%s4738_s1] sm:$0xff]  ;;  %v524_v2 = vld [vmem:[%s4738_s1 + $0x8] sm:$0xff]  ;;  %v525_v3 = vld [vmem:[%s4738_s1 + $0x10] sm:$0xff]  ;;  %v3953_v4 = vmov 0.0|0.0   ;;  %vm3954_vm1 = vmmov 0   ;;  %v3955_v7 = vmov 0.0  }
  0x94   : > { %3371 = vmatprep.subr.bf16.mxu1 %v3953_v4  ;;  %v4221_v5 = vpack.c.bf16 %v524_v2, %v523_v1  ;;  %v526_v6 = vld [vmem:[%s4738_s1 + $0x18] sm:$0xff]  ;;  %3028 = vmatprep.mubr.msk.f32.mxu1 %vm3954_vm1, %v3955_v7  ;;  %v540_v8 = vld [vmem:[%s4748_s11] sm:$0xff]  ;;  %v541_v9 = vld [vmem:[%s4748_s11 + $0x8] sm:$0xff]  ;;  %vm562_vm2 = vcmask 261120   ;;  %s3956_s26 = smov 32   ;;  %s3957_s15 = smov 96  }
  0x95   : > { %v4235_v10 = vpack.c.bf16 %v526_v6, %v525_v3  ;;  %v4238_v11 = vpack.c.bf16 %v541_v9, %v540_v8  ;;  %v4241_v12 = vld [vmem:[#allocation2] sm:$0xff]  ;;  %v542_v13 = vld [vmem:[%s4748_s11 + $0x10] sm:$0xff]  ;;  %v543_v14 = vld [vmem:[%s4748_s11 + $0x18] sm:$0xff]  ;;  %p2836_p11 = scmp.ne.s32.totalorder %s4043_s16, 1 }
  0x96   : > { %3373 = vmatpush3.bf16.msra.mxu1 %v4221_v5  ;;  %v4253_v15 = vpack.c.bf16 %v543_v14, %v542_v13  ;;  %v4258_v16 = vld [vmem:[#allocation3] ss:$0 sm:$0xff]  ;;  %v4261_v17 = vld [vmem:[%s4207_s28] sm:$0xff]  ;;  %v546_v30 = vld [vmem:[%s4749_s12 + $0x10] sm:$0xff]  ;;  %vm3959_vm3 = vmmov (!%p2836_p11), 0   ;;  %vm2675_vm4 = vcmask (!%p2836_p11), 15360  }
  0x97   : > { %3374 = vmatprep.subr.bf16.mxu1 %v3953_v4  ;;  %v4269_v21 = vadd.f32 %v4261_v17, %v4241_v12  ;;  %v4275_v24 = vmul.f32 %v4261_v17, %v4241_v12  ;;  %v544_v27 = vld [vmem:[%s4749_s12] sm:$0xff]  ;;  %v545_v28 = vld [vmem:[%s4749_s12 + $0x8] sm:$0xff]  ;;  %v547_v31 = vld [vmem:[%s4749_s12 + $0x18] sm:$0xff] }
  0x98   : > { %v4291_v29 = vpack.c.bf16 %v545_v28, %v544_v27  ;;  %v548_v32 = vld [vmem:[%s4749_s12 + $0x20] sm:$0xff]  ;;  %v4304_v33 = vpack.c.bf16 %v547_v31, %v546_v30  ;;  %v549_v34 = vld [vmem:[%s4749_s12 + $0x28] sm:$0xff]  ;;  %v550_v36 = vld [vmem:[%s4749_s12 + $0x30] sm:$0xff] }
  0x99   : > { %v4309_v35 = vpack.c.bf16 %v549_v34, %v548_v32  ;;  %v551_v37 = vld [vmem:[%s4749_s12 + $0x38] sm:$0xff]  ;;  %v552_v39 = vld [vmem:[%s4749_s12 + $0x40] sm:$0xff]  ;;  %v553_v40 = vld [vmem:[%s4749_s12 + $0x48] sm:$0xff] }
  0x9a   : > { %3376 = vmatpush3.bf16.msra.mxu1 %v4235_v10  ;;  %3386 = vmatprep.subr.bf16.mxu0 %v4291_v29  ;;  %v4320_v38 = vpack.c.bf16 %v551_v37, %v550_v36  ;;  %v4330_v41 = vpack.c.bf16 %v553_v40, %v552_v39  ;;  %v554_v42 = vld [vmem:[%s4749_s12 + $0x50] sm:$0xff]  ;;  %v555_v43 = vld [vmem:[%s4749_s12 + $0x58] sm:$0xff]  ;;  %v556_v45 = vld [vmem:[%s4749_s12 + $0x60] sm:$0xff] }
  0x9b   : > { %3378 = vmatprep.subr.bf16.mxu1 %v4238_v11  ;;  %3388 = vmatpush3.bf16.msra.mxu0 %v4291_v29  ;;  %v4340_v44 = vpack.c.bf16 %v555_v43, %v554_v42  ;;  %v557_v46 = vld [vmem:[%s4749_s12 + $0x68] sm:$0xff]  ;;  %v558_v48 = vld [vmem:[%s4749_s12 + $0x70] sm:$0xff]  ;;  %v559_v49 = vld [vmem:[%s4749_s12 + $0x78] sm:$0xff] }
  0x9c   : > { %3390 = vmatprep.subr.bf16.mxu0 %v4304_v33  ;;  %v4350_v47 = vpack.c.bf16 %v557_v46, %v556_v45  ;;  %v4360_v50 = vpack.c.bf16 %v559_v49, %v558_v48  ;;  %v528_v31 = vld [vmem:[%s4740_s3] sm:$0xff]  ;;  %v529_v32 = vld [vmem:[%s4740_s3 + $0x8] sm:$0xff]  ;;  %v530_v36 = vld [vmem:[%s4740_s3 + $0x10] sm:$0xff] }
  0x9d   : > { %3029 = vmatmul.mubr.msk.f32.vlgmr.msra.gmra.mrb[0].mxu1 %vm562_vm2, %v4241_v12  ;;  %v4388_v34 = vpack.c.bf16 %v529_v32, %v528_v31  ;;  %v531_v37 = vld [vmem:[%s4740_s3 + $0x18] sm:$0xff]  ;;  %v4448_v32 = vld [vmem:[#allocation11] ss:$0 sm:$0xff] }
  0x9e   : > { %3380 = vmatpush3.bf16.msra.mxu1 %v4238_v11  ;;  %v4398_v39 = vpack.c.bf16 %v531_v37, %v530_v36 }
  0x9f   : > { %3382 = vmatprep.subr.bf16.mxu1 %v4253_v15  ;;  %3392 = vmatpush3.bf16.msra.mxu0 %v4304_v33 }
  0xa0   : > { %3394 = vmatprep.subr.bf16.mxu0 %v4309_v35 }
  0xa2   : > { %3384 = vmatpush3.bf16.msra.mxu1 %v4253_v15 }
  0xa3   : > { %3417 = vmatprep.subr.bf16.mxu1 %v3953_v4  ;;  %3396 = vmatpush3.bf16.msra.mxu0 %v4309_v35 }
  0xa4   : > { %3398 = vmatprep.subr.bf16.mxu0 %v4320_v38 }
  0xa7   : > { %3400 = vmatpush3.bf16.msra.mxu0 %v4320_v38 }
  0xa8   : > { %3402 = vmatprep.subr.bf16.mxu0 %v4330_v41 }
  0xab   : > { %3404 = vmatpush3.bf16.msra.mxu0 %v4330_v41 }
  0xac   : > { %3406 = vmatprep.subr.bf16.mxu0 %v4340_v44 }
  0xaf   : > { %3408 = vmatpush3.bf16.msra.mxu0 %v4340_v44 }
  0xb0   : > { %3410 = vmatprep.subr.bf16.mxu0 %v4350_v47 }
  0xb3   : > { %3412 = vmatpush3.bf16.msra.mxu0 %v4350_v47 }
  0xb4   : > { %3414 = vmatprep.subr.bf16.mxu0 %v4360_v50 }
  0xb7   : > { %3416 = vmatpush3.bf16.msra.mxu0 %v4360_v50 }
  0xb8   : > { %3444 = vmatprep.subr.bf16.mxu0 %v4291_v29 }
 0x170   : > { %v4263_v18 = vpop.f32.mrb[0].mxu1 }
 0x171   : > { %v642_v19 = vadd.f32 %v4258_v16, %v4263_v18  ;;  %v3030_v20 = vpop.f32.mrb[1].mxu1 }
 0x173   : > { %v646_v22 = vmul.f32 %v642_v19, %v4261_v17  ;;  %v645_v23 = vmul.f32 %v642_v19, %v4241_v12  ;;  %v647_v25 = vmul.f32 %v4269_v21, %v642_v19  ;;  %v648_v26 = vmul.f32 %v4275_v24, %v642_v19 }
 0x175   : > { %3039 = vmatprep.mubr.msk.f32.mxu1 %vm562_vm2, %v645_v23 }
 0x176   : > { %3040 = vmatmul.mubr.msk.f32.vlgmr.msra.gmra.mrb[2].mxu1 %vm562_vm2, %v646_v22 }
 0x177   : > { %3042 = vmatprep.mubr.msk.f32.mxu1 %vm562_vm2, %v647_v25  ;;  %3419 = vmatpush3.bf16.msra.mxu1 %v4388_v34 }
 0x178   : > { %3420 = vmatprep.subr.bf16.mxu1 %v3953_v4 }
 0x17a   : > { %3043 = vmatmul.mubr.msk.f32.gmra.mrb[4].mxu1 %vm562_vm2, %v648_v26 }
 0x17b   : > { %3091 = vmatprep.mubr.msk.f32.mxu1 %vm3954_vm1, %v3955_v7  ;;  %3422 = vmatpush3.bf16.msra.mxu1 %v4398_v39 }
 0x17c   : > { %3423 = vmatprep.subr.bf16.mxu1 %v3953_v4 }
 0x249   : > { %v3041_v51 = vpop.f32.mrb[2].mxu1 }
 0x24a   : > { %v747_v52 = vmul.f32 0.35355338, %v3041_v51  ;;  %v727_v53 = vpop.f32.mrb[3].mxu1 }
 0x24b   : > { %v746_v54 = vmul.f32 0.35355338, %v727_v53 }
 0x24d   : > { %v750_v55 = vmax.f32 %v746_v54, %v747_v52  ;;  %v3044_v56 = vpop.f32.mrb[4].mxu1 }
 0x24e   : > { %v749_v57 = vmul.f32 0.35355338, %v3044_v56  ;;  %v737_v58 = vpop.f32.mrb[5].mxu1 }
 0x24f   : > { %v748_v59 = vmul.f32 0.35355338, %v737_v58  ;;  %v4429_v58 = vld [vmem:[#allocation6] ss:$0 sm:$0xff] }
 0x251   : > { %v751_v60 = vmax.f32 %v748_v59, %v749_v57 }
 0x253   : > { %v752_v61 = vmax.f32 %v750_v55, %v751_v60  ;;  %v534_v55 = vld [vmem:[%s4742_s5 + $0x8] sm:$0xff] }
 0x255   : > { %v756_v62 = vsub.f32 %v747_v52, %v752_v61  ;;  %v759_v63 = vsub.f32 %v748_v59, %v752_v61  ;;  %v762_v0 = vsub.f32 %v749_v57, %v752_v61  ;;  %v753_v1 = vsub.f32 %v746_v54, %v752_v61 }
 0x257   : > { %v757_v2 = vmul.f32 1.442695, %v756_v62  ;;  %v754_v3 = vmul.f32 1.442695, %v753_v1  ;;  %v760_v6 = vmul.f32 1.442695, %v759_v63 }
 0x258   : > { %v763_v8 = vmul.f32 1.442695, %v762_v0 }
 0x259   : > { %3684 = vpow2.f32 %v757_v2 }
 0x25a   : > { %3686 = vpow2.f32 %v754_v3 }
 0x25b   : > { %3688 = vpow2.f32 %v760_v6 }
 0x25c   : > { %3690 = vpow2.f32 %v763_v8 }
 0x263   : > { %v3685_v9 = vpop.eup %3684 }
 0x264   : > { %v3687_v13 = vpop.eup %3686 }
 0x265   : > { %v765_v14 = vadd.f32 %v3687_v13, %v3685_v9  ;;  %v3689_v19 = vpop.eup %3688 }
 0x266   : > { %v3691_v22 = vpop.eup %3690 }
 0x267   : > { %v766_v20 = vadd.f32 %v3689_v19, %v765_v14 }
 0x269   : > { %v767_v23 = vadd.f32 %v3691_v22, %v766_v20 }
 0x26b   : > { %3692 = vrcp.f32 %v767_v23  ;;  %v2805_v23 = vld [vmem:[#allocation8] ss:$0 sm:$0xff] }
 0x275   : > { %v3693_v25 = vpop.eup %3692 }
 0x276   : > { %v769_v26 = vmul.f32 %v3693_v25, %v3687_v13  ;;  %v770_v27 = vmul.f32 %v3693_v25, %v3685_v9  ;;  %v771_v28 = vmul.f32 %v3693_v25, %v3689_v19  ;;  %v772_v30 = vmul.f32 %v3693_v25, %v3691_v22 }
 0x278   : > { %3077 = vmatprep.mubr.f32.mxu0 %v769_v26 }
 0x279   : > { %3078 = vmatmul.mubr.f32.vlgmr.msra.gmra.mrb[0].mxu0 %v770_v27 }
 0x27a   : > { %3080 = vmatprep.mubr.f32.mxu0 %v771_v28  ;;  %3446 = vmatpush3.bf16.msra.mxu0 %v4291_v29 }
 0x27b   : > { %3448 = vmatprep.subr.bf16.mxu0 %v4304_v33 }
 0x27d   : > { %3081 = vmatmul.mubr.f32.gmra.mrb[2].mxu0 %v772_v30  ;;  %v4446_v30 = vld [vmem:[#allocation9] ss:$0 sm:$0xff] }
 0x27e   : > { %3450 = vmatpush3.bf16.msra.mxu0 %v4304_v33 }
 0x27f   : > { %3452 = vmatprep.subr.bf16.mxu0 %v4309_v35 }
 0x282   : > { %3454 = vmatpush3.bf16.msra.mxu0 %v4309_v35 }
 0x283   : > { %3456 = vmatprep.subr.bf16.mxu0 %v4320_v38 }
 0x286   : > { %3458 = vmatpush3.bf16.msra.mxu0 %v4320_v38 }
 0x287   : > { %3460 = vmatprep.subr.bf16.mxu0 %v4330_v41 }
 0x28a   : > { %3462 = vmatpush3.bf16.msra.mxu0 %v4330_v41 }
 0x28b   : > { %3464 = vmatprep.subr.bf16.mxu0 %v4340_v44 }
 0x28e   : > { %3466 = vmatpush3.bf16.msra.mxu0 %v4340_v44 }
 0x28f   : > { %3468 = vmatprep.subr.bf16.mxu0 %v4350_v47 }
 0x292   : > { %3470 = vmatpush3.bf16.msra.mxu0 %v4350_v47 }
 0x293   : > { %3472 = vmatprep.subr.bf16.mxu0 %v4360_v50 }
 0x296   : > { %3474 = vmatpush3.bf16.msra.mxu0 %v4360_v50 }
 0x297   : > { %3502 = vmatprep.subr.bf16.mxu0 %v4291_v29 }
 0x34c   : > { %v3079_v40 = vpop.f32.mrb[0].mxu0 }
 0x34d   : > { %v859_v42 = vmul.f32 %v3079_v40, %v4261_v17  ;;  %v839_v43 = vpop.f32.mrb[1].mxu0  ;;  %v533_v17 = vld [vmem:[%s4742_s5] sm:$0xff] }
 0x34e   : > { %v858_v45 = vmul.f32 %v839_v43, %v4241_v12  ;;  %v4415_v56 = vpack.c.bf16 %v534_v55, %v533_v17 }
 0x350   : > { %v860_v46 = vadd.f32 %v859_v42, %v858_v45  ;;  %v3082_v48 = vpop.f32.mrb[2].mxu0 }
 0x351   : > { %v849_v49 = vpop.f32.mrb[3].mxu0  ;;  %v863_v52 = vmul.f32 %v3082_v48, %v4275_v24  ;;  %v536_v24 = vld [vmem:[%s4742_s5 + $0x18] sm:$0xff] }
 0x352   : > { %v861_v51 = vmul.f32 %v849_v49, %v4269_v21  ;;  %v535_v21 = vld [vmem:[%s4742_s5 + $0x10] sm:$0xff] }
 0x353   : > { %v4425_v57 = vpack.c.bf16 %v536_v24, %v535_v21 }
 0x354   : > { %v862_v53 = vadd.f32 %v861_v51, %v860_v46 }
 0x356   : > { %v864_v54 = vadd.f32 %v863_v52, %v862_v53 }
 0x358   : > { %3092 = vmatmul.mubr.msk.f32.vlgmr.msra.gmra.mrb[6].mxu1 %vm562_vm2, %v864_v54 }
 0x359   : > { %3102 = vmatprep.mubr.msk.f32.mxu1 %vm3954_vm1, %v3955_v7  ;;  %3425 = vmatpush3.bf16.msra.mxu1 %v4415_v56 }
 0x35a   : > { %3426 = vmatprep.subr.bf16.mxu1 %v3953_v4 }
 0x35d   : > { %3428 = vmatpush3.bf16.msra.mxu1 %v4425_v57 }
 0x35e   : > { %3429 = vmatprep.subr.bf16.mxu1 %v3953_v4 }
 0x42b   : > { %v940_v59 = vpop.f32.mrb[6].mxu1 }
 0x42c   : > { %v941_v60 = vadd.f32 %v4429_v58, %v940_v59  ;;  %v3093_v61 = vpop.f32.mrb[7].mxu1 }
 0x42e   : > { %v945_v62 = vmul.f32 0.70710677, %v941_v60  ;;  %v944_v0 = vmul.f32 0.5, %v941_v60 }
 0x430   : > { %3694 = verf.f32 %v945_v62 }
 0x43a   : > { %v3695_v63 = vpop.eup %3694 }
 0x43b   : > { %v947_v1 = vadd.f32 1.0, %v3695_v63 }
 0x43d   : > { %v948_v2 = vmul.f32 %v947_v1, %v944_v0 }
 0x43f   : > { %3103 = vmatmul.mubr.msk.f32.vlgmr.msra.gmra.mrb[8].mxu1 %vm562_vm2, %v948_v2  ;;  %v1042_v3 = vadd.f32 %v948_v2, %v4241_v12 }
 0x440   : > { %3431 = vmatpush3.bf16.msra.mxu1 %v4221_v5  ;;  %3113 = vmatprep.mubr.msk.f32.mxu1 %vm3954_vm1, %v3955_v7 }
 0x441   : > { %v1043_v6 = vsel %vm562_vm2, %v1042_v3, 0.0  ;;  %3432 = vmatprep.subr.bf16.mxu1 %v3953_v4 }
 0x442   : > { %1044 = vadd.xlane.f32.xlu0 %v1043_v6 }
 0x444   : > { %3434 = vmatpush3.bf16.msra.mxu1 %v4235_v10 }
 0x445   : > { %3436 = vmatprep.subr.bf16.mxu1 %v4238_v11 }
 0x4cf   : > { %v1045_v8 = vpop.xlane.xlu0 %1044 }
 0x4d0   : > { %v1047_v9 = vmul.f32 0.03125, %v1045_v8 }
 0x4d2   : > { %v1048_v13 = vsub.f32 %v1042_v3, %v1047_v9 }
 0x4d4   : > { %v1049_v14 = vmul.f32 %v1048_v13, %v1048_v13 }
 0x4d6   : > { %v1050_v19 = vsel %vm562_vm2, %v1049_v14, 0.0 }
 0x4d7   : > { %1051 = vadd.xlane.f32.xlu0 %v1050_v19 }
 0x512   : > { %v1018_v20 = vpop.f32.mrb[8].mxu1 }
 0x513   : > { %1023 = vrot.lane.b32.xlu1 %v1018_v20, %s3956_s26  ;;  %v3104_v22 = vpop.f32.mrb[9].mxu1 }
 0x517   : > { %1032 = vrot.lane.b32.xlu1 %v2805_v23, %s3956_s26 }
 0x51b   : > { %1077 = vrot.lane.b32.xlu1 %v4241_v12, %s3956_s26 }
 0x564   : > { %v1052_v25 = vpop.xlane.xlu0 %1051 }
 0x565   : > { %v1053_v26 = vmul.f32 0.03125, %v1052_v25 }
 0x567   : > { %v1054_v27 = vadd.f32 1e-05, %v1053_v26 }
 0x569   : > { %3696 = vrsqrt.f32 %v1054_v27 }
 0x573   : > { %v3697_v28 = vpop.eup %3696 }
 0x574   : > { %v1056_v31 = vmul.f32 %v3697_v28, %v1048_v13 }
 0x576   : > { %v1063_v36 = vmul.f32 %v4446_v30, %v1056_v31 }
 0x578   : > { %v1070_v37 = vadd.f32 %v4448_v32, %v1063_v36 }
 0x57a   : > { %1072 = vrot.lane.b32.xlu0 %v1070_v37, %s3956_s26 }
 0x585   : > { %v1024_v40 = vpop.permute.xlu1 %1023 }
 0x586   : > { %v1026_v12 = vadd.f32 %v1024_v40, %v4263_v18  ;;  %v4462_v18 = vld [vmem:[%s4207_s28 + $0x8] sm:$0xff] }
 0x589   : > { %v4453_v42 = vpop.permute.xlu1 %1032 }
 0x58a   : > { %v1035_v43 = vadd.f32 %v4453_v42, %v1026_v12 }
 0x58c   : > { %v2806_v45 = vmul.f32 -1.442695, %v1035_v43 }
 0x58d   : > { %v1078_v52 = vpop.permute.xlu1 %1077 }
 0x58e   : > { %3698 = vpow2.f32 %v2806_v45 }
 0x598   : > { %v3699_v46 = vpop.eup %3698 }
 0x599   : > { %v1039_v48 = vadd.f32 1.0, %v3699_v46 }
 0x59b   : > { %3700 = vrcp.f32 %v1039_v48 }
 0x5a5   : > { %v3701_v49 = vpop.eup %3700 }
 0x5a6   : > { %v1076_v51 = vsub.f32 1.0, %v3701_v49 }
 0x5a8   : > { %v1080_v54 = vmul.f32 %v1078_v52, %v1076_v51 }
 0x5ec   : > { %v1073_v53 = vpop.permute.xlu0 %1072 }
 0x5ed   : > { %v1075_v17 = vmul.f32 %v3701_v49, %v1073_v53 }
 0x5ef   : > { %v4457_v55 = vadd.f32 %v1080_v54, %v1075_v17 }
 0x5f1   : > { %1085 = vrot.lane.b32.xlu1 %v4457_v55, %s3957_s15 }
 0x5f5   : > { %1161 = vrot.lane.b32.xlu1 %v4462_v18, %s3956_s26 }
 0x663   : > { %v4466_v21 = vpop.permute.xlu1 %1085 }
 0x664   : > { %3114 = vmatmul.mubr.msk.f32.vlgmr.msra.gmra.mrb[10].mxu1 %vm562_vm2, %v4466_v21 }
 0x665   : > { %3438 = vmatpush3.bf16.msra.mxu1 %v4238_v11 }
 0x666   : > { %3440 = vmatprep.subr.bf16.mxu1 %v4253_v15 }
 0x667   : > { %v1162_v24 = vpop.permute.xlu1 %1161 }
 0x668   : > { %v1164_v59 = vadd.f32 %v1162_v24, %v4457_v55  ;;  %v1165_v60 = vmul.f32 %v1162_v24, %v4457_v55 }
 0x669   : > { %3442 = vmatpush3.bf16.msra.mxu1 %v4253_v15 }
 0x66a   : > { %1170 = vrot.lane.b32.xlu1 %v1164_v59, %s3957_s15  ;;  %3475 = vmatprep.subr.bf16.mxu1 %v3953_v4 }
 0x66e   : > { %1175 = vrot.lane.b32.xlu1 %v1165_v60, %s3957_s15 }
 0x6dc   : > { %v4480_v62 = vpop.permute.xlu1 %1170 }
 0x6e0   : > { %v4489_v6 = vpop.permute.xlu1 %1175 }
 0x737   : > { %v4478_v61 = vpop.f32.mrb[10].mxu1 }
 0x738   : > { %v1159_v63 = vadd.f32 %v4258_v16, %v4478_v61  ;;  %v3115_v0 = vpop.f32.mrb[11].mxu1 }
 0x73a   : > { %v1168_v1 = vmul.f32 %v4462_v18, %v1159_v63  ;;  %v1167_v2 = vmul.f32 %v1159_v63, %v4466_v21  ;;  %v1173_v3 = vmul.f32 %v4480_v62, %v1159_v63  ;;  %v1178_v8 = vmul.f32 %v4489_v6, %v1159_v63 }
 0x73c   : > { %3124 = vmatprep.mubr.msk.f32.mxu1 %vm562_vm2, %v1167_v2 }
 0x73d   : > { %3125 = vmatmul.mubr.msk.f32.vlgmr.msra.gmra.mrb[12].mxu1 %vm562_vm2, %v1168_v1 }
 0x73e   : > { %3127 = vmatprep.mubr.msk.f32.mxu1 %vm562_vm2, %v1173_v3  ;;  %3477 = vmatpush3.bf16.msra.mxu1 %v4388_v34 }
 0x73f   : > { %3478 = vmatprep.subr.bf16.mxu1 %v3953_v4 }
 0x741   : > { %3128 = vmatmul.mubr.msk.f32.gmra.mrb[14].mxu1 %vm562_vm2, %v1178_v8 }
 0x742   : > { %3480 = vmatpush3.bf16.msra.mxu1 %v4398_v39  ;;  %3176 = vmatprep.mubr.msk.f32.mxu1 %vm3954_vm1, %v3955_v7 }
 0x743   : > { %3481 = vmatprep.subr.bf16.mxu1 %v3953_v4 }
 0x810   : > { %v3126_v9 = vpop.f32.mrb[12].mxu1 }
 0x811   : > { %v1277_v13 = vmul.f32 0.35355338, %v3126_v9  ;;  %v1257_v14 = vpop.f32.mrb[13].mxu1 }
 0x812   : > { %v1276_v19 = vmul.f32 0.35355338, %v1257_v14 }
 0x814   : > { %v1280_v20 = vmax.f32 %v1276_v19, %v1277_v13  ;;  %v3129_v22 = vpop.f32.mrb[14].mxu1 }
 0x815   : > { %v1279_v23 = vmul.f32 0.35355338, %v3129_v22  ;;  %v1267_v25 = vpop.f32.mrb[15].mxu1 }
 0x816   : > { %v1278_v26 = vmul.f32 0.35355338, %v1267_v25 }
 0x818   : > { %v1281_v27 = vmax.f32 %v1278_v26, %v1279_v23 }
 0x81a   : > { %v1282_v28 = vmax.f32 %v1280_v20, %v1281_v27 }
 0x81c   : > { %v1283_v31 = vsub.f32 %v1276_v19, %v1282_v28  ;;  %v1286_v36 = vsub.f32 %v1277_v13, %v1282_v28  ;;  %v1289_v37 = vsub.f32 %v1278_v26, %v1282_v28  ;;  %v1292_v40 = vsub.f32 %v1279_v23, %v1282_v28 }
 0x81e   : > { %v1284_v12 = vmul.f32 1.442695, %v1283_v31  ;;  %v1287_v43 = vmul.f32 1.442695, %v1286_v36  ;;  %v1290_v45 = vmul.f32 1.442695, %v1289_v37 }
 0x81f   : > { %v1293_v46 = vmul.f32 1.442695, %v1292_v40 }
 0x820   : > { %3702 = vpow2.f32 %v1284_v12 }
 0x821   : > { %3704 = vpow2.f32 %v1287_v43 }
 0x822   : > { %3706 = vpow2.f32 %v1290_v45 }
 0x823   : > { %3708 = vpow2.f32 %v1293_v46 }
 0x82a   : > { %v3703_v48 = vpop.eup %3702 }
 0x82b   : > { %v3705_v49 = vpop.eup %3704 }
 0x82c   : > { %v1295_v51 = vadd.f32 %v3705_v49, %v3703_v48  ;;  %v3707_v52 = vpop.eup %3706 }
 0x82d   : > { %v3709_v54 = vpop.eup %3708 }
 0x82e   : > { %v1296_v53 = vadd.f32 %v3707_v52, %v1295_v51 }
 0x830   : > { %v1297_v17 = vadd.f32 %v3709_v54, %v1296_v53 }
 0x832   : > { %3710 = vrcp.f32 %v1297_v17 }
 0x83c   : > { %v3711_v24 = vpop.eup %3710 }
 0x83d   : > { %v1299_v59 = vmul.f32 %v3711_v24, %v3703_v48  ;;  %v1300_v60 = vmul.f32 %v3711_v24, %v3705_v49  ;;  %v1301_v63 = vmul.f32 %v3711_v24, %v3707_v52  ;;  %v1302_v0 = vmul.f32 %v3711_v24, %v3709_v54  ;;  %v4540_v49 = vld [vmem:[%s4207_s28 + $0x10] sm:$0xff] }
 0x83f   : > { %3162 = vmatprep.mubr.f32.mxu0 %v1299_v59 }
 0x840   : > { %3163 = vmatmul.mubr.f32.vlgmr.msra.gmra.mrb[4].mxu0 %v1300_v60 }
 0x841   : > { %3165 = vmatprep.mubr.f32.mxu0 %v1301_v63  ;;  %3504 = vmatpush3.bf16.msra.mxu0 %v4291_v29 }
 0x842   : > { %3506 = vmatprep.subr.bf16.mxu0 %v4304_v33 }
 0x844   : > { %3166 = vmatmul.mubr.f32.gmra.mrb[6].mxu0 %v1302_v0 }
 0x845   : > { %3508 = vmatpush3.bf16.msra.mxu0 %v4304_v33 }
 0x846   : > { %3510 = vmatprep.subr.bf16.mxu0 %v4309_v35 }
 0x849   : > { %3512 = vmatpush3.bf16.msra.mxu0 %v4309_v35 }
 0x84a   : > { %3514 = vmatprep.subr.bf16.mxu0 %v4320_v38 }
 0x84d   : > { %3516 = vmatpush3.bf16.msra.mxu0 %v4320_v38 }
 0x84e   : > { %3518 = vmatprep.subr.bf16.mxu0 %v4330_v41 }
 0x851   : > { %3520 = vmatpush3.bf16.msra.mxu0 %v4330_v41 }
 0x852   : > { %3522 = vmatprep.subr.bf16.mxu0 %v4340_v44 }
 0x855   : > { %3524 = vmatpush3.bf16.msra.mxu0 %v4340_v44 }
 0x856   : > { %3526 = vmatprep.subr.bf16.mxu0 %v4350_v47 }
 0x859   : > { %3528 = vmatpush3.bf16.msra.mxu0 %v4350_v47 }
 0x85a   : > { %3530 = vmatprep.subr.bf16.mxu0 %v4360_v50 }
 0x85d   : > { %3532 = vmatpush3.bf16.msra.mxu0 %v4360_v50 }
 0x85e   : > { %3560 = vmatprep.subr.bf16.mxu0 %v4291_v29 }
 0x913   : > { %v3164_v1 = vpop.f32.mrb[4].mxu0 }
 0x914   : > { %v1389_v2 = vmul.f32 %v3164_v1, %v4462_v18  ;;  %v1369_v3 = vpop.f32.mrb[5].mxu0 }
 0x915   : > { %v1388_v8 = vmul.f32 %v1369_v3, %v4466_v21 }
 0x917   : > { %v1390_v9 = vadd.f32 %v1389_v2, %v1388_v8  ;;  %v3167_v13 = vpop.f32.mrb[6].mxu0 }
 0x918   : > { %v1379_v14 = vpop.f32.mrb[7].mxu0  ;;  %v1393_v20 = vmul.f32 %v3167_v13, %v4489_v6 }
 0x919   : > { %v1391_v19 = vmul.f32 %v1379_v14, %v4480_v62 }
 0x91b   : > { %v1392_v22 = vadd.f32 %v1391_v19, %v1390_v9 }
 0x91d   : > { %v1394_v23 = vadd.f32 %v1393_v20, %v1392_v22 }
 0x91f   : > { %3177 = vmatmul.mubr.msk.f32.vlgmr.msra.gmra.mrb[16].mxu1 %vm562_vm2, %v1394_v23 }
 0x920   : > { %3483 = vmatpush3.bf16.msra.mxu1 %v4415_v56  ;;  %3187 = vmatprep.mubr.msk.f32.mxu1 %vm3954_vm1, %v3955_v7 }
 0x921   : > { %3484 = vmatprep.subr.bf16.mxu1 %v3953_v4 }
 0x924   : > { %3486 = vmatpush3.bf16.msra.mxu1 %v4425_v57 }
 0x925   : > { %3487 = vmatprep.subr.bf16.mxu1 %v3953_v4 }
 0x9f2   : > { %v1464_v18 = vpop.f32.mrb[16].mxu1 }
 0x9f3   : > { %v1465_v62 = vadd.f32 %v4429_v58, %v1464_v18  ;;  %v3178_v25 = vpop.f32.mrb[17].mxu1 }
 0x9f5   : > { %v1469_v6 = vmul.f32 0.70710677, %v1465_v62  ;;  %v1468_v27 = vmul.f32 0.5, %v1465_v62 }
 0x9f7   : > { %3712 = verf.f32 %v1469_v6 }
 0xa01   : > { %v3713_v26 = vpop.eup %3712 }
 0xa02   : > { %v1471_v28 = vadd.f32 1.0, %v3713_v26 }
 0xa04   : > { %v1472_v31 = vmul.f32 %v1471_v28, %v1468_v27 }
 0xa06   : > { %3188 = vmatmul.mubr.msk.f32.vlgmr.msra.gmra.mrb[18].mxu1 %vm562_vm2, %v1472_v31  ;;  %v1558_v36 = vadd.f32 %v1472_v31, %v4466_v21 }
 0xa07   : > { %3489 = vmatpush3.bf16.msra.mxu1 %v4221_v5  ;;  %3198 = vmatprep.mubr.msk.f32.mxu1 %vm3954_vm1, %v3955_v7 }
 0xa08   : > { %v1559_v37 = vsel %vm562_vm2, %v1558_v36, 0.0  ;;  %3490 = vmatprep.subr.bf16.mxu1 %v3953_v4 }
 0xa09   : > { %1560 = vadd.xlane.f32.xlu1 %v1559_v37 }
 0xa0b   : > { %3492 = vmatpush3.bf16.msra.mxu1 %v4235_v10 }
 0xa0c   : > { %3494 = vmatprep.subr.bf16.mxu1 %v4238_v11 }
 0xa96   : > { %v1561_v40 = vpop.xlane.xlu1 %1560 }
 0xa97   : > { %v1562_v12 = vmul.f32 0.03125, %v1561_v40 }
 0xa99   : > { %v1563_v43 = vsub.f32 %v1558_v36, %v1562_v12 }
 0xa9b   : > { %v1564_v45 = vmul.f32 %v1563_v43, %v1563_v43 }
 0xa9d   : > { %v1565_v21 = vsel %vm562_vm2, %v1564_v45, 0.0 }
 0xa9e   : > { %1566 = vadd.xlane.f32.xlu0 %v1565_v21 }
 0xad9   : > { %v1542_v46 = vpop.f32.mrb[18].mxu1 }
 0xada   : > { %1547 = vrot.lane.b32.xlu0 %v1542_v46, %s3956_s26  ;;  %v3189_v48 = vpop.f32.mrb[19].mxu1 }
 0xade   : > { %1661 = vrot.lane.b32.xlu0 %v4540_v49, %s3956_s26 }
 0xb2b   : > { %v1567_v51 = vpop.xlane.xlu0 %1566 }
 0xb2c   : > { %v1568_v52 = vmul.f32 0.03125, %v1567_v51 }
 0xb2e   : > { %v1569_v53 = vadd.f32 1e-05, %v1568_v52 }
 0xb30   : > { %3714 = vrsqrt.f32 %v1569_v53 }
 0xb3a   : > { %v3715_v54 = vpop.eup %3714 }
 0xb3b   : > { %v1571_v17 = vmul.f32 %v3715_v54, %v1563_v43 }
 0xb3d   : > { %v1572_v24 = vmul.f32 %v4446_v30, %v1571_v17 }
 0xb3f   : > { %v1573_v59 = vadd.f32 %v4448_v32, %v1572_v24 }
 0xb41   : > { %1575 = vrot.lane.b32.xlu1 %v1573_v59, %s3956_s26 }
 0xb4c   : > { %v1548_v60 = vpop.permute.xlu0 %1547 }
 0xb4d   : > { %v1550_v63 = vadd.f32 %v1548_v60, %v4478_v61 }
 0xb4f   : > { %v1551_v0 = vadd.f32 %v1550_v63, %v4453_v42 }
 0xb50   : > { %v1662_v20 = vpop.permute.xlu0 %1661 }
 0xb51   : > { %v2817_v1 = vmul.f32 -1.442695, %v1551_v0 }
 0xb53   : > { %3716 = vpow2.f32 %v2817_v1 }
 0xb5d   : > { %v3717_v2 = vpop.eup %3716 }
 0xb5e   : > { %v1555_v3 = vadd.f32 1.0, %v3717_v2 }
 0xb60   : > { %3718 = vrcp.f32 %v1555_v3 }
 0xb6a   : > { %v3719_v8 = vpop.eup %3718 }
 0xb6b   : > { %v1579_v9 = vsub.f32 1.0, %v3719_v8 }
 0xb6d   : > { %v1580_v19 = vmul.f32 %v1579_v9, %v4457_v55 }
 0xbb3   : > { %v1576_v13 = vpop.permute.xlu1 %1575 }
 0xbb4   : > { %v1578_v14 = vmul.f32 %v3719_v8, %v1576_v13 }
 0xbb6   : > { %v4550_v22 = vadd.f32 %v1580_v19, %v1578_v14 }
 0xbb8   : > { %v1665_v23 = vmul.f32 %v1662_v20, %v4550_v22  ;;  %1585 = vrot.lane.b32.xlu1 %v4550_v22, %s3957_s15  ;;  %v1664_v61 = vadd.f32 %v1662_v20, %v4550_v22 }
 0xbba   : > { %1675 = vrot.lane.b32.xlu0 %v1665_v23, %s3957_s15 }
 0xbbc   : > { %1670 = vrot.lane.b32.xlu1 %v1664_v61, %s3957_s15 }
 0xc2a   : > { %v4558_v18 = vpop.permute.xlu1 %1585 }
 0xc2b   : > { %3199 = vmatmul.mubr.msk.f32.vlgmr.msra.gmra.mrb[20].mxu1 %vm562_vm2, %v4558_v18 }
 0xc2c   : > { %3496 = vmatpush3.bf16.msra.mxu1 %v4238_v11  ;;  %v4577_v31 = vpop.permute.xlu0 %1675 }
 0xc2d   : > { %3498 = vmatprep.subr.bf16.mxu1 %v4253_v15 }
 0xc2e   : > { %v4572_v27 = vpop.permute.xlu1 %1670 }
 0xc30   : > { %3500 = vmatpush3.bf16.msra.mxu1 %v4253_v15 }
 0xc31   : > { %3533 = vmatprep.subr.bf16.mxu1 %v3953_v4 }
 0xcfe   : > { %v4566_v55 = vpop.f32.mrb[20].mxu1 }
 0xcff   : > { %v1659_v62 = vadd.f32 %v4258_v16, %v4566_v55  ;;  %v3200_v25 = vpop.f32.mrb[21].mxu1 }
 0xd01   : > { %v1668_v6 = vmul.f32 %v4540_v49, %v1659_v62  ;;  %v1667_v26 = vmul.f32 %v1659_v62, %v4558_v18  ;;  %v1673_v28 = vmul.f32 %v4572_v27, %v1659_v62  ;;  %v1678_v16 = vmul.f32 %v4577_v31, %v1659_v62 }
 0xd03   : > { %3209 = vmatprep.mubr.msk.f32.mxu1 %vm562_vm2, %v1667_v26 }
 0xd04   : > { %3210 = vmatmul.mubr.msk.f32.vlgmr.msra.gmra.mrb[22].mxu1 %vm562_vm2, %v1668_v6 }
 0xd05   : > { %3212 = vmatprep.mubr.msk.f32.mxu1 %vm562_vm2, %v1673_v28  ;;  %3535 = vmatpush3.bf16.msra.mxu1 %v4388_v34 }
 0xd06   : > { %3536 = vmatprep.subr.bf16.mxu1 %v3953_v4 }
 0xd08   : > { %3213 = vmatmul.mubr.msk.f32.gmra.mrb[24].mxu1 %vm562_vm2, %v1678_v16 }
 0xd09   : > { %3538 = vmatpush3.bf16.msra.mxu1 %v4398_v39  ;;  %3261 = vmatprep.mubr.msk.f32.mxu1 %vm3954_vm1, %v3955_v7 }
 0xd0a   : > { %3539 = vmatprep.subr.bf16.mxu1 %v3953_v4 }
 0xdd7   : > { %v3211_v36 = vpop.f32.mrb[22].mxu1 }
 0xdd8   : > { %v1777_v37 = vmul.f32 0.35355338, %v3211_v36  ;;  %v1757_v40 = vpop.f32.mrb[23].mxu1 }
 0xdd9   : > { %v1776_v12 = vmul.f32 0.35355338, %v1757_v40 }
 0xddb   : > { %v1780_v43 = vmax.f32 %v1776_v12, %v1777_v37  ;;  %v3214_v45 = vpop.f32.mrb[24].mxu1 }
 0xddc   : > { %v1779_v21 = vmul.f32 0.35355338, %v3214_v45  ;;  %v1767_v46 = vpop.f32.mrb[25].mxu1 }
 0xddd   : > { %v1778_v48 = vmul.f32 0.35355338, %v1767_v46 }
 0xddf   : > { %v1781_v51 = vmax.f32 %v1778_v48, %v1779_v21 }
 0xde1   : > { %v1782_v52 = vmax.f32 %v1780_v43, %v1781_v51 }
 0xde3   : > { %v1783_v53 = vsub.f32 %v1776_v12, %v1782_v52  ;;  %v1786_v54 = vsub.f32 %v1777_v37, %v1782_v52  ;;  %v1789_v17 = vsub.f32 %v1778_v48, %v1782_v52  ;;  %v1792_v24 = vsub.f32 %v1779_v21, %v1782_v52  ;;  %v4627_v52 = vld [vmem:[%s4207_s28 + $0x18] sm:$0xff] }
 0xde5   : > { %v1784_v59 = vmul.f32 1.442695, %v1783_v53  ;;  %v1787_v60 = vmul.f32 1.442695, %v1786_v54  ;;  %v1790_v63 = vmul.f32 1.442695, %v1789_v17 }
 0xde6   : > { %v1793_v0 = vmul.f32 1.442695, %v1792_v24 }
 0xde7   : > { %3720 = vpow2.f32 %v1784_v59 }
 0xde8   : > { %3722 = vpow2.f32 %v1787_v60 }
 0xde9   : > { %3724 = vpow2.f32 %v1790_v63 }
 0xdea   : > { %3726 = vpow2.f32 %v1793_v0 }
 0xdf1   : > { %v3721_v1 = vpop.eup %3720 }
 0xdf2   : > { %v3723_v2 = vpop.eup %3722 }
 0xdf3   : > { %v1795_v3 = vadd.f32 %v3723_v2, %v3721_v1  ;;  %v3725_v8 = vpop.eup %3724 }
 0xdf4   : > { %v3727_v13 = vpop.eup %3726 }
 0xdf5   : > { %v1796_v9 = vadd.f32 %v3725_v8, %v1795_v3 }
 0xdf7   : > { %v1797_v14 = vadd.f32 %v3727_v13, %v1796_v9 }
 0xdf9   : > { %3728 = vrcp.f32 %v1797_v14 }
 0xe03   : > { %v3729_v19 = vpop.eup %3728 }
 0xe04   : > { %v1799_v20 = vmul.f32 %v3729_v19, %v3721_v1  ;;  %v1800_v23 = vmul.f32 %v3729_v19, %v3723_v2  ;;  %v1801_v61 = vmul.f32 %v3729_v19, %v3725_v8  ;;  %v1802_v62 = vmul.f32 %v3729_v19, %v3727_v13 }
 0xe06   : > { %3247 = vmatprep.mubr.f32.mxu0 %v1799_v20 }
 0xe07   : > { %3248 = vmatmul.mubr.f32.vlgmr.msra.gmra.mrb[8].mxu0 %v1800_v23 }
 0xe08   : > { %3250 = vmatprep.mubr.f32.mxu0 %v1801_v61  ;;  %3562 = vmatpush3.bf16.msra.mxu0 %v4291_v29 }
 0xe09   : > { %3564 = vmatprep.subr.bf16.mxu0 %v4304_v33 }
 0xe0b   : > { %3251 = vmatmul.mubr.f32.gmra.mrb[10].mxu0 %v1802_v62 }
 0xe0c   : > { %3566 = vmatpush3.bf16.msra.mxu0 %v4304_v33 }
 0xe0d   : > { %3568 = vmatprep.subr.bf16.mxu0 %v4309_v35 }
 0xe10   : > { %3570 = vmatpush3.bf16.msra.mxu0 %v4309_v35 }
 0xe11   : > { %3572 = vmatprep.subr.bf16.mxu0 %v4320_v38 }
 0xe14   : > { %3574 = vmatpush3.bf16.msra.mxu0 %v4320_v38 }
 0xe15   : > { %3576 = vmatprep.subr.bf16.mxu0 %v4330_v41 }
 0xe18   : > { %3578 = vmatpush3.bf16.msra.mxu0 %v4330_v41 }
 0xe19   : > { %3580 = vmatprep.subr.bf16.mxu0 %v4340_v44 }
 0xe1c   : > { %3582 = vmatpush3.bf16.msra.mxu0 %v4340_v44 }
 0xe1d   : > { %3584 = vmatprep.subr.bf16.mxu0 %v4350_v47 }
 0xe20   : > { %3586 = vmatpush3.bf16.msra.mxu0 %v4350_v47 }
 0xe21   : > { %3588 = vmatprep.subr.bf16.mxu0 %v4360_v50 }
 0xe24   : > { %3590 = vmatpush3.bf16.msra.mxu0 %v4360_v50 }
 0xeda   : > { %v3249_v29 = vpop.f32.mrb[8].mxu0 }
 0xedb   : > { %v1889_v33 = vmul.f32 %v3249_v29, %v4540_v49  ;;  %v1869_v35 = vpop.f32.mrb[9].mxu0 }
 0xedc   : > { %v1888_v38 = vmul.f32 %v1869_v35, %v4558_v18 }
 0xede   : > { %v1890_v25 = vadd.f32 %v1889_v33, %v1888_v38  ;;  %v3252_v41 = vpop.f32.mrb[10].mxu0  ;;  %v3756_v33 = vld [vmem:[#allocation3] ss:$0 sm:$0xff] }
 0xedf   : > { %v1879_v6 = vpop.f32.mrb[11].mxu0  ;;  %v1893_v44 = vmul.f32 %v3252_v41, %v4577_v31 }
 0xee0   : > { %v1891_v26 = vmul.f32 %v1879_v6, %v4572_v27 }
 0xee2   : > { %v1892_v28 = vadd.f32 %v1891_v26, %v1890_v25 }
 0xee4   : > { %v1894_v16 = vadd.f32 %v1893_v44, %v1892_v28 }
 0xee6   : > { %3262 = vmatmul.mubr.msk.f32.vlgmr.msra.gmra.mrb[26].mxu1 %vm562_vm2, %v1894_v16 }
 0xee7   : > { %3541 = vmatpush3.bf16.msra.mxu1 %v4415_v56  ;;  %3272 = vmatprep.mubr.msk.f32.mxu1 %vm3954_vm1, %v3955_v7 }
 0xee8   : > { %3542 = vmatprep.subr.bf16.mxu1 %v3953_v4 }
 0xeeb   : > { %3544 = vmatpush3.bf16.msra.mxu1 %v4425_v57 }
 0xeec   : > { %3545 = vmatprep.subr.bf16.mxu1 %v3953_v4 }
 0xfb9   : > { %v1964_v47 = vpop.f32.mrb[26].mxu1 }
 0xfba   : > { %v1965_v50 = vadd.f32 %v4429_v58, %v1964_v47  ;;  %v3263_v49 = vpop.f32.mrb[27].mxu1 }
 0xfbc   : > { %v1969_v27 = vmul.f32 0.70710677, %v1965_v50  ;;  %v1968_v36 = vmul.f32 0.5, %v1965_v50 }
 0xfbe   : > { %3730 = verf.f32 %v1969_v27 }
 0xfc8   : > { %v3731_v31 = vpop.eup %3730 }
 0xfc9   : > { %v1971_v37 = vadd.f32 1.0, %v3731_v31 }
 0xfcb   : > { %v1972_v40 = vmul.f32 %v1971_v37, %v1968_v36 }
 0xfcd   : > { %3273 = vmatmul.mubr.msk.f32.vlgmr.msra.gmra.mrb[28].mxu1 %vm562_vm2, %v1972_v40  ;;  %v2058_v12 = vadd.f32 %v1972_v40, %v4558_v18 }
 0xfce   : > { %3547 = vmatpush3.bf16.msra.mxu1 %v4221_v5  ;;  %3283 = vmatprep.mubr.msk.f32.mxu1 %vm3954_vm1, %v3955_v7 }
 0xfcf   : > { %v2059_v43 = vsel %vm562_vm2, %v2058_v12, 0.0  ;;  %3548 = vmatprep.subr.bf16.mxu1 %v3953_v4 }
 0xfd0   : > { %2060 = vadd.xlane.f32.xlu1 %v2059_v43 }
 0xfd2   : > { %3550 = vmatpush3.bf16.msra.mxu1 %v4235_v10 }
 0xfd3   : > { %3552 = vmatprep.subr.bf16.mxu1 %v4238_v11 }
0x105d   : > { %v2061_v45 = vpop.xlane.xlu1 %2060 }
0x105e   : > { %v2062_v21 = vmul.f32 0.03125, %v2061_v45 }
0x1060   : > { %v2063_v46 = vsub.f32 %v2058_v12, %v2062_v21 }
0x1062   : > { %v2064_v48 = vmul.f32 %v2063_v46, %v2063_v46 }
0x1064   : > { %v2065_v18 = vsel %vm562_vm2, %v2064_v48, 0.0 }
0x1065   : > { %2066 = vadd.xlane.f32.xlu0 %v2065_v18 }
0x10a0   : > { %v2042_v5 = vpop.f32.mrb[28].mxu1 }
0x10a1   : > { %2047 = vrot.lane.b32.xlu0 %v2042_v5, %s3956_s26  ;;  %v3274_v51 = vpop.f32.mrb[29].mxu1 }
0x10a5   : > { %2161 = vrot.lane.b32.xlu0 %v4627_v52, %s3956_s26 }
0x10f2   : > { %v2067_v53 = vpop.xlane.xlu0 %2066 }
0x10f3   : > { %v2068_v10 = vmul.f32 0.03125, %v2067_v53 }
0x10f5   : > { %v2069_v54 = vadd.f32 1e-05, %v2068_v10 }
0x10f7   : > { %3732 = vrsqrt.f32 %v2069_v54 }
0x1101   : > { %v3733_v17 = vpop.eup %3732 }
0x1102   : > { %v2071_v24 = vmul.f32 %v3733_v17, %v2063_v46 }
0x1104   : > { %v2072_v59 = vmul.f32 %v4446_v30, %v2071_v24 }
0x1106   : > { %v2073_v60 = vadd.f32 %v4448_v32, %v2072_v59 }
0x1108   : > { %2075 = vrot.lane.b32.xlu1 %v2073_v60, %s3956_s26 }
0x1113   : > { %v2048_v63 = vpop.permute.xlu0 %2047 }
0x1114   : > { %v2050_v0 = vadd.f32 %v2048_v63, %v4566_v55 }
0x1116   : > { %v2051_v1 = vadd.f32 %v2050_v0, %v4453_v42 }
0x1117   : > { %v2162_v23 = vpop.permute.xlu0 %2161 }
0x1118   : > { %v2826_v2 = vmul.f32 -1.442695, %v2051_v1 }
0x111a   : > { %3734 = vpow2.f32 %v2826_v2 }
0x1124   : > { %v3735_v3 = vpop.eup %3734 }
0x1125   : > { %v2055_v8 = vadd.f32 1.0, %v3735_v3 }
0x1127   : > { %3736 = vrcp.f32 %v2055_v8 }
0x1131   : > { %v3737_v9 = vpop.eup %3736 }
0x1132   : > { %v2079_v13 = vsub.f32 1.0, %v3737_v9 }
0x1134   : > { %v2080_v20 = vmul.f32 %v2079_v13, %v4550_v22 }
0x117a   : > { %v2076_v14 = vpop.permute.xlu1 %2075 }
0x117b   : > { %v2078_v19 = vmul.f32 %v3737_v9, %v2076_v14 }
0x117d   : > { %v4637_v61 = vadd.f32 %v2080_v20, %v2078_v19 }
0x117f   : > { %v2165_v62 = vmul.f32 %v2162_v23, %v4637_v61  ;;  %2085 = vrot.lane.b32.xlu1 %v4637_v61, %s3957_s15  ;;  %v2164_v55 = vadd.f32 %v2162_v23, %v4637_v61 }
0x1181   : > { %2175 = vrot.lane.b32.xlu0 %v2165_v62, %s3957_s15 }
0x1183   : > { %2170 = vrot.lane.b32.xlu1 %v2164_v55, %s3957_s15 }
0x11f1   : > { %v4645_v29 = vpop.permute.xlu1 %2085 }
0x11f2   : > { %3284 = vmatmul.mubr.msk.f32.vlgmr.msra.gmra.mrb[30].mxu1 %vm562_vm2, %v4645_v29 }
0x11f3   : > { %3554 = vmatpush3.bf16.msra.mxu1 %v4238_v11  ;;  %v2176_v26 = vpop.permute.xlu0 %2175 }
0x11f4   : > { %3556 = vmatprep.subr.bf16.mxu1 %v4253_v15 }
0x11f5   : > { %v2171_v6 = vpop.permute.xlu1 %2170 }
0x11f7   : > { %3558 = vmatpush3.bf16.msra.mxu1 %v4253_v15 }
0x11f8   : > { %3591 = vmatprep.subr.bf16.mxu1 %v3953_v4 }
0x12c5   : > { %v4653_v22 = vpop.f32.mrb[30].mxu1 }
0x12c6   : > { %v2159_v35 = vadd.f32 %v3756_v33, %v4653_v22  ;;  %v3285_v38 = vpop.f32.mrb[31].mxu1 }
0x12c8   : > { %v2168_v25 = vmul.f32 %v4627_v52, %v2159_v35  ;;  %v2167_v41 = vmul.f32 %v2159_v35, %v4645_v29  ;;  %v2173_v11 = vmul.f32 %v2171_v6, %v2159_v35  ;;  %v2178_v15 = vmul.f32 %v2176_v26, %v2159_v35 }
0x12ca   : > { %3294 = vmatprep.mubr.msk.f32.mxu1 %vm562_vm2, %v2167_v41 }
0x12cb   : > { %3295 = vmatmul.mubr.msk.f32.vlgmr.msra.gmra.mrb[32].mxu1 %vm562_vm2, %v2168_v25 }
0x12cc   : > { %3297 = vmatprep.mubr.msk.f32.mxu1 %vm562_vm2, %v2173_v11  ;;  %3593 = vmatpush3.bf16.msra.mxu1 %v4388_v34 }
0x12cd   : > { %3594 = vmatprep.subr.bf16.mxu1 %v3953_v4 }
0x12cf   : > { %3298 = vmatmul.mubr.msk.f32.gmra.mrb[34].mxu1 %vm562_vm2, %v2178_v15 }
0x12d0   : > { %3596 = vmatpush3.bf16.msra.mxu1 %v4398_v39  ;;  %3346 = vmatprep.mubr.msk.f32.mxu1 %vm3954_vm1, %v3955_v7 }
0x12d1   : > { %3597 = vmatprep.subr.bf16.mxu1 %v3953_v4 }
0x139e   : > { %v3296_v44 = vpop.f32.mrb[32].mxu1 }
0x139f   : > { %v2277_v28 = vmul.f32 0.35355338, %v3296_v44  ;;  %v2257_v16 = vpop.f32.mrb[33].mxu1 }
0x13a0   : > { %v2276_v47 = vmul.f32 0.35355338, %v2257_v16 }
0x13a2   : > { %v2280_v50 = vmax.f32 %v2276_v47, %v2277_v28  ;;  %v3299_v49 = vpop.f32.mrb[34].mxu1 }
0x13a3   : > { %v2279_v27 = vmul.f32 0.35355338, %v3299_v49  ;;  %v2267_v34 = vpop.f32.mrb[35].mxu1 }
0x13a4   : > { %v2278_v31 = vmul.f32 0.35355338, %v2267_v34 }
0x13a6   : > { %v2281_v36 = vmax.f32 %v2278_v31, %v2279_v27 }
0x13a8   : > { %v2282_v37 = vmax.f32 %v2280_v50, %v2281_v36 }
0x13aa   : > { %v2283_v40 = vsub.f32 %v2276_v47, %v2282_v37  ;;  %v2286_v12 = vsub.f32 %v2277_v28, %v2282_v37  ;;  %v2289_v43 = vsub.f32 %v2278_v31, %v2282_v37  ;;  %v2292_v39 = vsub.f32 %v2279_v27, %v2282_v37 }
0x13ac   : > { %v2284_v45 = vmul.f32 1.442695, %v2283_v40  ;;  %v2287_v21 = vmul.f32 1.442695, %v2286_v12  ;;  %v2290_v46 = vmul.f32 1.442695, %v2289_v43 }
0x13ad   : > { %v2293_v48 = vmul.f32 1.442695, %v2292_v39 }
0x13ae   : > { %3738 = vpow2.f32 %v2284_v45 }
0x13af   : > { %3740 = vpow2.f32 %v2287_v21 }
0x13b0   : > { %3742 = vpow2.f32 %v2290_v46 }
0x13b1   : > { %3744 = vpow2.f32 %v2293_v48  ;;  %v3958_v48 = vmov (!%p2836_p11), 0.0|0.0  }
0x13b2   : > { %3603 = vmatprep.subr.bf16.mxu0 (!%p2836_p11), %v3958_v48 }
0x13b8   : > { %v3739_v18 = vpop.eup %3738 }
0x13b9   : > { %v3741_v5 = vpop.eup %3740 }
0x13ba   : > { %v2295_v51 = vadd.f32 %v3741_v5, %v3739_v18  ;;  %v3743_v53 = vpop.eup %3742 }
0x13bb   : > { %v3745_v54 = vpop.eup %3744 }
0x13bc   : > { %v2296_v10 = vadd.f32 %v3743_v53, %v2295_v51  ;;  %v3960_v51 = vmov (!%p2836_p11), 0.0  }
0x13be   : > { %v2297_v17 = vadd.f32 %v3745_v54, %v2296_v10  ;;  %v2837_v10 = vld [vmem:[%s4747_s10] ss:$0 sm:$0xff] (!%p2836_p11) }
0x13c0   : > { %3746 = vrcp.f32 %v2297_v17 }
0x13ca   : > { %v3747_v24 = vpop.eup %3746 }
0x13cb   : > { %v2299_v59 = vmul.f32 %v3747_v24, %v3739_v18  ;;  %v2300_v60 = vmul.f32 %v3747_v24, %v3741_v5  ;;  %v2301_v63 = vmul.f32 %v3747_v24, %v3743_v53  ;;  %v2302_v0 = vmul.f32 %v3747_v24, %v3745_v54  ;;  %v2595_v5 = vld [vmem:[%s4746_s9 + $0x18] sm:$0xff] (!%p2836_p11) }
0x13cd   : > { %3332 = vmatprep.mubr.f32.mxu0 %v2299_v59 }
0x13ce   : > { %3333 = vmatmul.mubr.f32.vlgmr.msra.gmra.mrb[12].mxu0 %v2300_v60 }
0x13cf   : > { %3335 = vmatprep.mubr.f32.mxu0 %v2301_v63 }
0x13d2   : > { %3336 = vmatmul.mubr.f32.gmra.mrb[14].mxu0 %v2302_v0 }
0x13d3   : > { %3368 = vmatprep.mubr.msk.f32.mxu0 (!%p2836_p11), %vm3959_vm3, %v3960_v51 }
0x14a1   : > { %v3334_v1 = vpop.f32.mrb[12].mxu0 }
0x14a2   : > { %v2389_v2 = vmul.f32 %v3334_v1, %v4627_v52  ;;  %v2369_v3 = vpop.f32.mrb[13].mxu0 }
0x14a3   : > { %v2388_v8 = vmul.f32 %v2369_v3, %v4645_v29 }
0x14a5   : > { %v2390_v9 = vadd.f32 %v2389_v2, %v2388_v8  ;;  %v3337_v13 = vpop.f32.mrb[14].mxu0 }
0x14a6   : > { %v2379_v14 = vpop.f32.mrb[15].mxu0  ;;  %v2393_v20 = vmul.f32 %v3337_v13, %v2176_v26 }
0x14a7   : > { %v2391_v19 = vmul.f32 %v2379_v14, %v2171_v6 }
0x14a9   : > { %v2392_v23 = vadd.f32 %v2391_v19, %v2390_v9 }
0x14ab   : > { %v2394_v62 = vadd.f32 %v2393_v20, %v2392_v23 }
0x14ad   : > { %3347 = vmatmul.mubr.msk.f32.vlgmr.msra.gmra.mrb[36].mxu1 %vm562_vm2, %v2394_v62 }
0x14ae   : > { %3599 = vmatpush3.bf16.msra.mxu1 %v4415_v56  ;;  %3357 = vmatprep.mubr.msk.f32.mxu1 %vm3954_vm1, %v3955_v7 }
0x14af   : > { %3600 = vmatprep.subr.bf16.mxu1 %v3953_v4 }
0x14b2   : > { %3602 = vmatpush3.bf16.msra.mxu1 %v4425_v57 }
0x1580   : > { %v2464_v52 = vpop.f32.mrb[36].mxu1 }
0x1581   : > { %v2465_v55 = vadd.f32 %v4429_v58, %v2464_v52  ;;  %v3348_v33 = vpop.f32.mrb[37].mxu1 }
0x1583   : > { %v2469_v35 = vmul.f32 0.70710677, %v2465_v55  ;;  %v2468_v25 = vmul.f32 0.5, %v2465_v55 }
0x1585   : > { %3748 = verf.f32 %v2469_v35 }
0x158f   : > { %v3749_v38 = vpop.eup %3748 }
0x1590   : > { %v2471_v41 = vadd.f32 1.0, %v3749_v38 }
0x1592   : > { %v2472_v6 = vmul.f32 %v2471_v41, %v2468_v25 }
0x1594   : > { %3358 = vmatmul.mubr.msk.f32.vlgmr.msra.gmra.mrb[38].mxu1 %vm562_vm2, %v2472_v6  ;;  %v2558_v56 = vadd.f32 %v2472_v6, %v4645_v29 }
0x1596   : > { %v2559_v7 = vsel %vm562_vm2, %v2558_v56, 0.0 }
0x1597   : > { %2560 = vadd.xlane.f32.xlu1 %v2559_v7 }
0x1624   : > { %v2561_v4 = vpop.xlane.xlu1 %2560 }
0x1625   : > { %v2562_v11 = vmul.f32 0.03125, %v2561_v4 }
0x1627   : > { %v2563_v57 = vsub.f32 %v2558_v56, %v2562_v11 }
0x1629   : > { %v2564_v26 = vmul.f32 %v2563_v57, %v2563_v57 }
0x162b   : > { %v2565_v58 = vsel %vm562_vm2, %v2564_v26, 0.0 }
0x162c   : > { %2566 = vadd.xlane.f32.xlu0 %v2565_v58 }
0x1667   : > { %v2542_v15 = vpop.f32.mrb[38].mxu1 }
0x1668   : > { %2547 = vrot.lane.b32.xlu0 %v2542_v15, %s3956_s26  ;;  %v3359_v44 = vpop.f32.mrb[39].mxu1 }
0x16b9   : > { %v2567_v28 = vpop.xlane.xlu0 %2566 }
0x16ba   : > { %v2568_v16 = vmul.f32 0.03125, %v2567_v28 }
0x16bc   : > { %v2569_v47 = vadd.f32 1e-05, %v2568_v16 }
0x16be   : > { %3750 = vrsqrt.f32 %v2569_v47 }
0x16c8   : > { %v3751_v50 = vpop.eup %3750 }
0x16c9   : > { %v2571_v29 = vmul.f32 %v3751_v50, %v2563_v57 }
0x16cb   : > { %v2572_v49 = vmul.f32 %v4446_v30, %v2571_v29 }
0x16cd   : > { %v2573_v27 = vadd.f32 %v4448_v32, %v2572_v49 }
0x16cf   : > { %2575 = vrot.lane.b32.xlu1 %v2573_v27, %s3956_s26 }
0x16da   : > { %v2548_v34 = vpop.permute.xlu0 %2547 }
0x16db   : > { %v2550_v31 = vadd.f32 %v2548_v34, %v4653_v22  ;;  %v2593_v22 = vld [vmem:[%s4746_s9 + $0x8] sm:$0xff] (!%p2836_p11) }
0x16dd   : > { %v2551_v36 = vadd.f32 %v2550_v31, %v4453_v42  ;;  %v2592_v42 = vld [vmem:[%s4746_s9] sm:$0xff] (!%p2836_p11) }
0x16de   : > { %v3604_v18 = vpack.c.bf16 (!%p2836_p11), %v2593_v22, %v2592_v42 }
0x16df   : > { %v2835_v37 = vmul.f32 -1.442695, %v2551_v36 }
0x16e0   : > { %3605 = vmatpush3.bf16.msra.mxu0 (!%p2836_p11), %v3604_v18 }
0x16e1   : > { %3752 = vpow2.f32 %v2835_v37  ;;  %3606 = vmatprep.subr.bf16.mxu0 (!%p2836_p11), %v3958_v48 }
0x16eb   : > { %v3753_v40 = vpop.eup %3752 }
0x16ec   : > { %v2555_v12 = vadd.f32 1.0, %v3753_v40 }
0x16ee   : > { %3754 = vrcp.f32 %v2555_v12 }
0x16f8   : > { %v3755_v43 = vpop.eup %3754 }
0x16f9   : > { %v2579_v39 = vsub.f32 1.0, %v3755_v43 }
0x16fb   : > { %v2580_v30 = vmul.f32 %v2579_v39, %v4637_v61  ;;  %v2594_v61 = vld [vmem:[%s4746_s9 + $0x10] sm:$0xff] (!%p2836_p11) }
0x16fc   : > { %v3607_v53 = vpack.c.bf16 (!%p2836_p11), %v2595_v5, %v2594_v61 }
0x16fe   : > { %3608 = vmatpush3.bf16.msra.mxu0 (!%p2836_p11), %v3607_v53 }
0x1741   : > { %v2576_v45 = vpop.permute.xlu1 %2575 }
0x1742   : > { %v2578_v21 = vmul.f32 %v3755_v43, %v2576_v45 }
0x1744   : > { %v2581_v46 = vadd.f32 %v2580_v30, %v2578_v21 }
0x1746   : > { %2583 = vrot.lane.b32.xlu1 %v2581_v46, %s3957_s15 }
0x17b3   : > { %2590 = sbr.rel (%p2836_p11) target bundleno = 6288 (0x1890), region = 100 }
0x17b8   : > { %v2584_v32 = vpop.permute.xlu1 %2583 }
0x17b9   : > { %2586 = vst.msk [vmem:[#allocation2] sm:$0xff] %vm562_vm2, %v2584_v32  ;;  %2591 = vst.msk [vmem:[#allocation12] sm:$0xff] (!%p2836_p11), %vm562_vm2, %v2584_v32  ;;  %3369 = vmatmul.mubr.msk.f32.vlgmr.msra.gmra.mrb[0].mxu0 (!%p2836_p11), %vm562_vm2, %v2584_v32 }
0x188c   : > { %v2671_v54 = vpop.f32.mrb[0].mxu0 }
0x188d   : > { %v2672_v17 = vadd.f32 %v2837_v10, %v2671_v54  ;;  %v3370_v24 = vpop.f32.mrb[1].mxu0 }
0x188f   : > { %2676 = vst.msk [vmem:[%s4750_s13] sm:$0xff] %vm2675_vm4, %v2672_v17 }
0x1890 PF: > { %p3659_p12 = scmp.eq.s32.totalorder %s4043_s16, 1  ;;  %s3961_s23 = smov [#allocation12]  }
0x1891   : > { %s2687_s25 = sshll.u32 %s3961_s23, 4  ;;  %s2688_s25 = int_to_ptr.vmem [resolvable:$true] %s2687_s25 }
0x1892   : > { %s3897_s26 = scalar_lea.vmem %s2688_s25, 128  ;;  %p3904_p1 = scmp.lt.s32.totalorder %s2688_s25, %s2688_s25 }
0x1893   : > { %p3898_p2 = scmp.ne.s32.totalorder %s2688_s25, %s3897_s26  ;;  %p3905_p5 = scmp.lt.s32.totalorder %s3897_s26, %s3897_s26 }
0x1895   : > { %p3899_p13 = pnand %p3898_p2, %p3659_p12  ;;  %p3906_p8 = por %p3905_p5, %p3904_p1 }
0x1897   : > { %p3900_p0 = pneg %p3899_p13 }
0x1899   : > { %p3907_p7 = pnand %p3906_p8, %p3900_p0 }
0x189b   : > { %3910 = shalt.err (!%p3907_p7)
}
0x189c   : > { %s4769_s21 = sld [smem:[#allocation18_spill]] }
0x18a2   : > { %s3911_s24 = scalar_lea.hbm %s4769_s21, 128 }
0x18a3   : > { %p3912_p3 = scmp.ne.s32.totalorder %s4769_s21, %s3911_s24  ;;  %p3917_p9 = scmp.lt.u32.totalorder %s3911_s24, %s4769_s21 }
0x18a5   : > { %p3913_p4 = pnand %p3912_p3, %p3659_p12 }
0x18a7   : > { %p3914_p6 = pneg %p3913_p4 }
0x18a9   : > { %p3919_p10 = pnand %p3917_p9, %p3914_p6 }
0x18ab   : > { %3922 = shalt.err (!%p3919_p10)
}
0x18ac   : > { %3630 = dma.vmem_to_hbm [thread:$0]  (%p3659_p12), %s2688_s25, 128, %s4769_s21, [#allocation5]  }
0x18ad   : > { %3940 = dma.done.wait (%p3659_p12), [#allocation5], 128  }
0x18ae   : > { %3942 = vsyncadd (%p3659_p12), [#allocation5], 4294967168 }
0x18af PF: > { %s4770_s27 = sld [smem:[#allocation17_spill]] }
0x18b5   : > { %s29_s29 = sadd.s32 1, %s4770_s27  }
0x18b6   : > { %p26_p11 = scmp.ge.s32.totalorder %s29_s29, 4  }
0x18b8   :  { %28 = sbr.rel (!%p26_p11) target bundleno = 6 (0x6), region = 139 }
0x18bf   :  { %2703 = vsyncpa [#allocation4], 1 }
0x18c0   :  { %2705 = vsyncpa [#allocation4 + $0x1], 1 }
0x18c1   :  { %2706 = vsyncpa [#allocation7], 1 }
0x18c2   :  { %2707 = vsyncpa [#allocation10], 1 }
0x18c3   :  { %2708 = vsyncpa [#allocation5], 1 }
0x18c4   :  { %2710 = vsyncpa [#allocation5 + $0x1], 1 }

</bundles_post_ra>
